<compile_context>
chip_gen: v5e
topology: v5e:2x2
jax: 0.10.0
libtpu: 0.0.40
codegen_flags: <defaults>
</compile_context>

<pallas_src>
import functools

import jax
import jax.numpy as jnp
from jax import lax
from jax.experimental import pallas as pl
from jax.experimental.pallas import tpu as pltpu

EPS = 1e-5   # nn.GroupNorm default eps
LANE = 128   # TPU lane width; block-diagonal adjacency operands are built at this width


def unit_gcn_kernel(x_ref, bd_ref, w_ref, seg_ref, segt_ref, p_ref, chan_ref,
                    o_ref, rhs_ref, *, groups):
    # x_ref:    (Cp, Nb*TV)             mxu dtype; rows = [C_in channels, ones row, zero pad]
    # bd_ref:   (128, (K+1)*128)        mxu dtype; K block-diag A_k replicas + identity block
    # w_ref:    (2*C_out, (K+1)*Cp)     mxu dtype; [[Wc_k|bc_k] blocks, 0 ; 0, [Wd|bd]] fused
    # seg_ref:  (Nb*TV, Nb)   f32       per-sample column segment-sum matrix
    # segt_ref: (Nb, Nb*TV)   f32       its transpose (segment broadcast)
    # p_ref:    (2*C_out, 2*C_out) f32  channel group-sum matrix (both GroupNorms at once)
    # chan_ref: (2*C_out, 2)  f32       col 0 = [gamma; gd], col 1 = [beta; bd2]
    # o_ref:    (Nb, C_out, TV)         output dtype
    # rhs_ref:  ((K+1)*Cp, Nb*TV)       mxu-dtype VMEM scratch (stacked A-contracted inputs)
    Cp, NbTV = x_ref.shape
    Nb, C_out, TV = o_ref.shape
    n_sub = rhs_ref.shape[0] // Cp            # K + 1 (last block = identity / residual)
    M = NbTV // LANE
    Cg = C_out // groups
    cd = x_ref.dtype

    # Hoisted constant loads.
    bdcat = bd_ref[...]
    wfused = w_ref[...]
    seg = seg_ref[...]
    segt = segt_ref[...]
    pmat = p_ref[...]
    gamma = chan_ref[:, 0:1]
    beta = chan_ref[:, 1:2]

    # ---- 1. lane-dense A-contraction: all K subsets (+ identity residual block) per chunk ----
    # Per 128-lane chunk: (Cp, 128) @ (128, (K+1)*128); each 128-wide result block lands in the
    # RHS scratch at a static row offset -> no concatenate, no V-minor relayouts, cast once.
    def do_chunk(off):
        xc = x_ref[:, pl.ds(off, LANE)]                                        # (Cp, 128)
        ya = jnp.dot(xc, bdcat, preferred_element_type=jnp.float32).astype(cd)
        for k in range(n_sub):                                                 # static, small
            rhs_ref[pl.ds(k * Cp, Cp), pl.ds(off, LANE)] = ya[:, k * LANE:(k + 1) * LANE]

    if M <= 32:
        for m in range(M):                    # static offsets -> fully aligned loads/stores
            do_chunk(m * LANE)
    else:
        def body(m, carry):                   # large blocks: keep the schedule compact
            do_chunk(pl.multiple_of(m * LANE, LANE))
            return carry
        lax.fori_loop(0, M, body, 0)

    # ---- 2. one fused 1x1-conv matmul: main (K subsets) + residual + all biases, whole block ----
    zr = jnp.dot(wfused, rhs_ref[...], preferred_element_type=jnp.float32)     # (2C_out, Nb*TV)

    # ---- 3. GroupNorm for both branches at once (two-pass variance; per-sample stats via
    #         tiny segment-sum / segment-broadcast matmuls, all in f32) ----
    inv_cnt = 1.0 / float(Cg * TV)
    s1 = jnp.dot(zr, seg, preferred_element_type=jnp.float32)                  # (2C, Nb)
    mean_cn = jnp.dot(pmat, s1, preferred_element_type=jnp.float32) * inv_cnt  # per-channel group mean
    d = zr - jnp.dot(mean_cn, segt, preferred_element_type=jnp.float32)        # centered (two-pass)
    s2 = jnp.dot(d * d, seg, preferred_element_type=jnp.float32)               # (2C, Nb)
    var_cn = jnp.dot(pmat, s2, preferred_element_type=jnp.float32) * inv_cnt
    scale_cn = lax.rsqrt(var_cn + EPS) * gamma                                 # (2C, Nb)  (EUP)
    un = d * jnp.dot(scale_cn, segt, preferred_element_type=jnp.float32) + beta

    # ---- 4. add the two normalized branches, ReLU, lane-dense per-sample stores ----
    y = jnp.maximum(un[:C_out] + un[C_out:], 0.0)                              # (C_out, Nb*TV)
    for i in range(Nb):                                                        # stores only
        o_ref[i] = y[:, i * TV:(i + 1) * TV].astype(o_ref.dtype)


def unit_gcn_forward(x, Wc, bc, A, gamma, beta, Wd, bd, gd, bd2, *, groups=8,
                     n_block=None, mxu_dtype=jnp.float32, out_dtype=jnp.float32,
                     vmem_limit_bytes=64 * 1024 * 1024):
    # TODO(synk): when C_in == C_out the PyTorch module uses an identity residual
    # (down = Identity, no GroupNorm); this wrapper implements the Conv2d+GroupNorm residual.
    N, C_in, T, V = x.shape
    K, C_out, _ = Wc.shape
    TV = T * V
    assert C_out % groups == 0
    # TODO(synk): for V not dividing 128 (e.g. V=25 skeletons) pad the joint axis to 32/64.
    assert LANE % V == 0, "V must divide 128"

    # n_block: largest divisor of N (<= 8 samples/step) that still leaves >= 2 grid steps,
    # so the DMA/compute pipeline (and both v7x TensorCores via the 'parallel' axis) has work.
    if n_block is None:
        n_block = 1
        for cand in range(1, min(N, 8) + 1):
            if N % cand == 0 and (N // cand) >= 2:
                n_block = cand
    assert N % n_block == 0
    NbTV = n_block * TV
    assert NbTV % LANE == 0, "n_block * T * V must be a multiple of 128"

    Cp = ((C_in + 1 + 7) // 8) * 8        # input channels + ones row, padded to sublane multiple
    Cg = C_out // groups

    # ---- wrapper-side layout plumbing & operand packing (one-time XLA work) ----
    # x_aug: (Cp, N*TV); columns ordered (sample, t, v); the ones row carries the conv biases.
    xf = jnp.transpose(x, (1, 0, 2, 3)).reshape(C_in, N * TV)
    x_aug = jnp.concatenate(
        [xf, jnp.ones((1, N * TV), xf.dtype),
         jnp.zeros((Cp - C_in - 1, N * TV), xf.dtype)], axis=0).astype(mxu_dtype)

    # BDcat: (128, (K+1)*128) = [blockdiag(A_0), ..., blockdiag(A_{K-1}), I_128].
    rep = LANE // V
    bd_blocks = [jnp.kron(jnp.eye(rep, dtype=jnp.float32), A[k].astype(jnp.float32))
                 for k in range(K)]
    bd_blocks.append(jnp.eye(LANE, dtype=jnp.float32))
    bdcat = jnp.concatenate(bd_blocks, axis=1).astype(mxu_dtype)

    # Fused weights (2*C_out, (K+1)*Cp); conv biases folded into the ones-row column.
    def wblock(Wmat, bvec):
        return jnp.concatenate(
            [Wmat.astype(jnp.float32), bvec.reshape(C_out, 1).astype(jnp.float32),
             jnp.zeros((C_out, Cp - C_in - 1), jnp.float32)], axis=1)
    zero_blk = jnp.zeros((C_out, Cp), jnp.float32)
    w_top = jnp.concatenate([wblock(Wc[k], bc[k, :, 0]) for k in range(K)] + [zero_blk], axis=1)
    w_bot = jnp.concatenate([zero_blk] * K + [wblock(Wd, bd[:, 0])], axis=1)
    wfused = jnp.concatenate([w_top, w_bot], axis=0).astype(mxu_dtype)

    # Per-sample segment-sum / broadcast matrices and the channel group-sum matrix (tiny).
    col_sample = jnp.arange(NbTV, dtype=jnp.int32) // TV
    seg = (col_sample[:, None] == jnp.arange(n_block, dtype=jnp.int32)[None, :]
           ).astype(jnp.float32)                                               # (Nb*TV, Nb)
    segt = seg.T                                                               # (Nb, Nb*TV)
    ch = jnp.arange(2 * C_out, dtype=jnp.int32)
    pmat = (ch[:, None] // Cg == ch[None, :] // Cg).astype(jnp.float32)        # (2C, 2C)
    chan = jnp.stack([jnp.concatenate([gamma[:, 0], gd[:, 0]]),
                      jnp.concatenate([beta[:, 0], bd2[:, 0]])], axis=1).astype(jnp.float32)

    esize = jnp.dtype(mxu_dtype).itemsize
    cost = pl.CostEstimate(
        flops=int(2 * N * TV * ((K + 1) * LANE * Cp + 2 * C_out * (K + 1) * Cp)),
        transcendentals=int(2 * C_out * N),
        bytes_accessed=int(x_aug.size * esize
                           + N * C_out * TV * jnp.dtype(out_dtype).itemsize
                           + (bdcat.size + wfused.size) * esize
                           + (seg.size + segt.size + pmat.size + chan.size) * 4),
    )

    kernel = functools.partial(unit_gcn_kernel, groups=groups)
    out = pl.pallas_call(
        kernel,
        out_shape=jax.ShapeDtypeStruct((N, C_out, TV), out_dtype),
        grid=(N // n_block,),
        in_specs=[
            pl.BlockSpec((Cp, NbTV), lambda n: (0, n)),       # per-block x slab
            # Grid-invariant operands: constant block index -> DMA'd once, not per step.
            pl.BlockSpec(bdcat.shape, lambda n: (0, 0)),
            pl.BlockSpec(wfused.shape, lambda n: (0, 0)),
            pl.BlockSpec(seg.shape, lambda n: (0, 0)),
            pl.BlockSpec(segt.shape, lambda n: (0, 0)),
            pl.BlockSpec(pmat.shape, lambda n: (0, 0)),
            pl.BlockSpec(chan.shape, lambda n: (0, 0)),
        ],
        out_specs=pl.BlockSpec((n_block, C_out, TV), lambda n: (n, 0, 0)),
        scratch_shapes=[pltpu.VMEM(((K + 1) * Cp, NbTV), mxu_dtype)],
        compiler_params=pltpu.CompilerParams(
            dimension_semantics=("parallel",),   # independent sample blocks
            # Tunable per generation: v5e/v6e can raise toward 96-128 MiB with a larger
            # n_block; keep <= ~48-64 MiB on v7x (64 MiB physical VMEM per TensorCore).
            vmem_limit_bytes=vmem_limit_bytes,
        ),
        cost_estimate=cost,
    )(x_aug, bdcat, wfused, seg, segt, pmat, chan)
    return out.reshape(N, C_out, T, V)


def reference_forward(x, Wc, bc, A, gamma, beta, Wd, bd, gd, bd2, *, groups=8):
    # Pure-JAX mirror of the PyTorch forward for validation.
    N, C_in, T, V = x.shape
    K, C_out, _ = Wc.shape
    xf = x.reshape(N, C_in, T * V)
    y = jnp.einsum('koc,nct->nkot', Wc, xf) + bc[None]          # (N, K, C_out, T*V)
    y = y.reshape(N, K, C_out, T, V)
    z = jnp.einsum('nkctv,kvw->nctw', y, A)                     # (N, C_out, T, V)

    def gn(u, g, b):
        u5 = u.reshape(N, groups, C_out // groups, T, V)
        m = u5.mean(axis=(2, 3, 4), keepdims=True)
        v_ = ((u5 - m) ** 2).mean(axis=(2, 3, 4), keepdims=True)
        un = ((u5 - m) / jnp.sqrt(v_ + EPS)).reshape(N, C_out, T, V)
        return un * g.reshape(1, C_out, 1, 1) + b.reshape(1, C_out, 1, 1)

    r = (jnp.einsum('oc,nct->not', Wd, xf) + bd[None]).reshape(N, C_out, T, V)
    return jnp.maximum(gn(z, gamma, beta) + gn(r, gd, bd2), 0.0)


if __name__ == "__main__":
    # Small shapes consistent with the module (C_in != C_out -> Conv+GroupNorm residual path).
    N, C_in, C_out, T, V = 4, 4, 16, 16, 16
    K = 3                 # num_subsets = A.size(0)
    GROUPS = 8            # group_size -> nn.GroupNorm(8, C_out); 2 channels per group

    key = jax.random.PRNGKey(0)
    k_x, k_wc, k_bc, k_A, k_wd, k_bd, k_g, k_b = jax.random.split(key, 8)

    x = jax.random.normal(k_x, (N, C_in, T, V), dtype=jnp.float32)

    # Conv2d(C_in, C_out*K, 1): weight -> (K, C_out, C_in), bias -> (K, C_out, 1)
    Wc = 0.1 * jax.random.normal(k_wc, (K, C_out, C_in), dtype=jnp.float32)
    bc = 0.1 * jax.random.normal(k_bc, (K, C_out, 1), dtype=jnp.float32)

    # Adjacency parameter A (adaptive='init' -> nn.Parameter(A.clone()))
    A = (jnp.tile(jnp.eye(V, dtype=jnp.float32)[None], (K, 1, 1))
         + 0.1 * jax.random.normal(k_A, (K, V, V), dtype=jnp.float32))

    # Main-branch GroupNorm affine params
    gamma = 1.0 + 0.1 * jax.random.normal(k_g, (C_out, 1), dtype=jnp.float32)
    beta = 0.1 * jax.random.normal(k_b, (C_out, 1), dtype=jnp.float32)

    # down = Conv2d(C_in, C_out, 1) + GroupNorm
    Wd = 0.1 * jax.random.normal(k_wd, (C_out, C_in), dtype=jnp.float32)
    bd = 0.1 * jax.random.normal(k_bd, (C_out, 1), dtype=jnp.float32)
    gd = jnp.ones((C_out, 1), jnp.float32)
    bd2 = jnp.zeros((C_out, 1), jnp.float32)

    ref = reference_forward(x, Wc, bc, A, gamma, beta, Wd, bd, gd, bd2, groups=GROUPS)

    # f32 MXU path (n_block heuristic picks 2 -> grid=(2,): both v7x cores / pipeline active).
    out = unit_gcn_forward(x, Wc, bc, A, gamma, beta, Wd, bd, gd, bd2, groups=GROUPS)
    out = jax.block_until_ready(out)
    assert out.shape == (N, C_out, T, V)
    assert jnp.allclose(out, ref, atol=1e-3, rtol=1e-3), "f32 Pallas kernel mismatch vs reference"

    # bf16 MXU inputs (f32 accumulation) + bf16 output (v5e vst/HBM relief); loose tolerance.
    out_bf = unit_gcn_forward(x, Wc, bc, A, gamma, beta, Wd, bd, gd, bd2, groups=GROUPS,
                              mxu_dtype=jnp.bfloat16, out_dtype=jnp.bfloat16)
    out_bf = jax.block_until_ready(out_bf).astype(jnp.float32)
    assert jnp.allclose(out_bf, ref, atol=1e-1, rtol=1e-1), "bf16 Pallas kernel mismatch vs reference"

    print("KERNEL_OK")
</pallas_src>

<mosaic_0001>
module attributes {stable_mosaic.version = 11 : i64} {
  func.func @unit_gcn_kernel(%arg0: i32, %arg1: memref<8x512xf32, #tpu.memory_space<vmem>>, %arg2: memref<128x512xf32, #tpu.memory_space<vmem>>, %arg3: memref<32x32xf32, #tpu.memory_space<vmem>>, %arg4: memref<512x2xf32, #tpu.memory_space<vmem>>, %arg5: memref<2x512xf32, #tpu.memory_space<vmem>>, %arg6: memref<32x32xf32, #tpu.memory_space<vmem>>, %arg7: memref<32x2xf32, #tpu.memory_space<vmem>>, %arg8: memref<2x16x256xf32, #tpu.memory_space<vmem>>, %arg9: memref<32x512xf32, #tpu.memory_space<vmem>>) attributes {dimension_semantics = [#tpu.dimension_semantics<parallel>], iteration_bounds = array<i64: 2>, scalar_prefetch = 0 : i64, scratch_operands = 1 : i64, tpu.core_type = #tpu.core_type<tc>, window_params = [{transform_indices = @transform_0, window_bounds = array<i64: 8, 512>}, {pipeline_mode = #tpu.pipeline_mode<synchronous>, transform_indices = @transform_1, window_bounds = array<i64: 128, 512>}, {pipeline_mode = #tpu.pipeline_mode<synchronous>, transform_indices = @transform_2, window_bounds = array<i64: 32, 32>}, {pipeline_mode = #tpu.pipeline_mode<synchronous>, transform_indices = @transform_3, window_bounds = array<i64: 512, 2>}, {pipeline_mode = #tpu.pipeline_mode<synchronous>, transform_indices = @transform_4, window_bounds = array<i64: 2, 512>}, {pipeline_mode = #tpu.pipeline_mode<synchronous>, transform_indices = @transform_5, window_bounds = array<i64: 32, 32>}, {pipeline_mode = #tpu.pipeline_mode<synchronous>, transform_indices = @transform_6, window_bounds = array<i64: 32, 2>}, {transform_indices = @transform_7, window_bounds = array<i64: 2, 16, 256>}]} {
    %c0 = arith.constant 0 : index
    %c0_0 = arith.constant 0 : index
    %0 = vector.load %arg2[%c0, %c0_0] : memref<128x512xf32, #tpu.memory_space<vmem>>, vector<128x512xf32>
    %c0_1 = arith.constant 0 : index
    %c0_2 = arith.constant 0 : index
    %1 = vector.load %arg3[%c0_1, %c0_2] : memref<32x32xf32, #tpu.memory_space<vmem>>, vector<32x32xf32>
    %c0_3 = arith.constant 0 : index
    %c0_4 = arith.constant 0 : index
    %2 = vector.load %arg4[%c0_3, %c0_4] : memref<512x2xf32, #tpu.memory_space<vmem>>, vector<512x2xf32>
    %c0_5 = arith.constant 0 : index
    %c0_6 = arith.constant 0 : index
    %3 = vector.load %arg5[%c0_5, %c0_6] : memref<2x512xf32, #tpu.memory_space<vmem>>, vector<2x512xf32>
    %c0_7 = arith.constant 0 : index
    %c0_8 = arith.constant 0 : index
    %4 = vector.load %arg6[%c0_7, %c0_8] : memref<32x32xf32, #tpu.memory_space<vmem>>, vector<32x32xf32>
    %c0_9 = arith.constant 0 : index
    %c0_10 = arith.constant 0 : index
    %5 = vector.load %arg7[%c0_9, %c0_10] : memref<32x2xf32, #tpu.memory_space<vmem>>, vector<32x1xf32>
    %c0_11 = arith.constant 0 : index
    %c1 = arith.constant 1 : index
    %6 = vector.load %arg7[%c0_11, %c1] : memref<32x2xf32, #tpu.memory_space<vmem>>, vector<32x1xf32>
    %c0_12 = arith.constant 0 : index
    %c0_13 = arith.constant 0 : index
    %7 = vector.load %arg1[%c0_12, %c0_13] : memref<8x512xf32, #tpu.memory_space<vmem>>, vector<8x128xf32>
    %cst = arith.constant dense<0.000000e+00> : vector<8x512xf32>
    %8 = tpu.matmul %7, %0, %cst {dimension_numbers = #tpu.dot_dimension_numbers<[1], [0], [0], [1], [0, 0, 1, 1], [], []>} : vector<8x128xf32>, vector<128x512xf32>, vector<8x512xf32> -> vector<8x512xf32>
    %9 = vector.extract_strided_slice %8 {offsets = [0, 0], sizes = [8, 128], strides = [1, 1]} : vector<8x512xf32> to vector<8x128xf32>
    %c0_14 = arith.constant 0 : index
    %c0_15 = arith.constant 0 : index
    %10 = vector.load %arg9[%c0_14, %c0_15] : memref<32x512xf32, #tpu.memory_space<vmem>>, vector<8x128xf32>
    tpu.vector_store %arg9[%c0_14, %c0_15], %9 {strides = array<i32>} : memref<32x512xf32, #tpu.memory_space<vmem>>, vector<8x128xf32>,
    %11 = vector.extract_strided_slice %8 {offsets = [0, 128], sizes = [8, 128], strides = [1, 1]} : vector<8x512xf32> to vector<8x128xf32>
    %c8 = arith.constant 8 : index
    %c0_16 = arith.constant 0 : index
    %12 = vector.load %arg9[%c8, %c0_16] : memref<32x512xf32, #tpu.memory_space<vmem>>, vector<8x128xf32>
    tpu.vector_store %arg9[%c8, %c0_16], %11 {strides = array<i32>} : memref<32x512xf32, #tpu.memory_space<vmem>>, vector<8x128xf32>,
    %13 = vector.extract_strided_slice %8 {offsets = [0, 256], sizes = [8, 128], strides = [1, 1]} : vector<8x512xf32> to vector<8x128xf32>
    %c16 = arith.constant 16 : index
    %c0_17 = arith.constant 0 : index
    %14 = vector.load %arg9[%c16, %c0_17] : memref<32x512xf32, #tpu.memory_space<vmem>>, vector<8x128xf32>
    tpu.vector_store %arg9[%c16, %c0_17], %13 {strides = array<i32>} : memref<32x512xf32, #tpu.memory_space<vmem>>, vector<8x128xf32>,
    %15 = vector.extract_strided_slice %8 {offsets = [0, 384], sizes = [8, 128], strides = [1, 1]} : vector<8x512xf32> to vector<8x128xf32>
    %c24 = arith.constant 24 : index
    %c0_18 = arith.constant 0 : index
    %16 = vector.load %arg9[%c24, %c0_18] : memref<32x512xf32, #tpu.memory_space<vmem>>, vector<8x128xf32>
    tpu.vector_store %arg9[%c24, %c0_18], %15 {strides = array<i32>} : memref<32x512xf32, #tpu.memory_space<vmem>>, vector<8x128xf32>,
    %c0_19 = arith.constant 0 : index
    %c128 = arith.constant 128 : index
    %17 = vector.load %arg1[%c0_19, %c128] : memref<8x512xf32, #tpu.memory_space<vmem>>, vector<8x128xf32>
    %cst_20 = arith.constant dense<0.000000e+00> : vector<8x512xf32>
    %18 = tpu.matmul %17, %0, %cst_20 {dimension_numbers = #tpu.dot_dimension_numbers<[1], [0], [0], [1], [0, 0, 1, 1], [], []>} : vector<8x128xf32>, vector<128x512xf32>, vector<8x512xf32> -> vector<8x512xf32>
    %19 = vector.extract_strided_slice %18 {offsets = [0, 0], sizes = [8, 128], strides = [1, 1]} : vector<8x512xf32> to vector<8x128xf32>
    %c0_21 = arith.constant 0 : index
    %c128_22 = arith.constant 128 : index
    %20 = vector.load %arg9[%c0_21, %c128_22] : memref<32x512xf32, #tpu.memory_space<vmem>>, vector<8x128xf32>
    tpu.vector_store %arg9[%c0_21, %c128_22], %19 {strides = array<i32>} : memref<32x512xf32, #tpu.memory_space<vmem>>, vector<8x128xf32>,
    %21 = vector.extract_strided_slice %18 {offsets = [0, 128], sizes = [8, 128], strides = [1, 1]} : vector<8x512xf32> to vector<8x128xf32>
    %c8_23 = arith.constant 8 : index
    %c128_24 = arith.constant 128 : index
    %22 = vector.load %arg9[%c8_23, %c128_24] : memref<32x512xf32, #tpu.memory_space<vmem>>, vector<8x128xf32>
    tpu.vector_store %arg9[%c8_23, %c128_24], %21 {strides = array<i32>} : memref<32x512xf32, #tpu.memory_space<vmem>>, vector<8x128xf32>,
    %23 = vector.extract_strided_slice %18 {offsets = [0, 256], sizes = [8, 128], strides = [1, 1]} : vector<8x512xf32> to vector<8x128xf32>
    %c16_25 = arith.constant 16 : index
    %c128_26 = arith.constant 128 : index
    %24 = vector.load %arg9[%c16_25, %c128_26] : memref<32x512xf32, #tpu.memory_space<vmem>>, vector<8x128xf32>
    tpu.vector_store %arg9[%c16_25, %c128_26], %23 {strides = array<i32>} : memref<32x512xf32, #tpu.memory_space<vmem>>, vector<8x128xf32>,
    %25 = vector.extract_strided_slice %18 {offsets = [0, 384], sizes = [8, 128], strides = [1, 1]} : vector<8x512xf32> to vector<8x128xf32>
    %c24_27 = arith.constant 24 : index
    %c128_28 = arith.constant 128 : index
    %26 = vector.load %arg9[%c24_27, %c128_28] : memref<32x512xf32, #tpu.memory_space<vmem>>, vector<8x128xf32>
    tpu.vector_store %arg9[%c24_27, %c128_28], %25 {strides = array<i32>} : memref<32x512xf32, #tpu.memory_space<vmem>>, vector<8x128xf32>,
    %c0_29 = arith.constant 0 : index
    %c256 = arith.constant 256 : index
    %27 = vector.load %arg1[%c0_29, %c256] : memref<8x512xf32, #tpu.memory_space<vmem>>, vector<8x128xf32>
    %cst_30 = arith.constant dense<0.000000e+00> : vector<8x512xf32>
    %28 = tpu.matmul %27, %0, %cst_30 {dimension_numbers = #tpu.dot_dimension_numbers<[1], [0], [0], [1], [0, 0, 1, 1], [], []>} : vector<8x128xf32>, vector<128x512xf32>, vector<8x512xf32> -> vector<8x512xf32>
    %29 = vector.extract_strided_slice %28 {offsets = [0, 0], sizes = [8, 128], strides = [1, 1]} : vector<8x512xf32> to vector<8x128xf32>
    %c0_31 = arith.constant 0 : index
    %c256_32 = arith.constant 256 : index
    %30 = vector.load %arg9[%c0_31, %c256_32] : memref<32x512xf32, #tpu.memory_space<vmem>>, vector<8x128xf32>
    tpu.vector_store %arg9[%c0_31, %c256_32], %29 {strides = array<i32>} : memref<32x512xf32, #tpu.memory_space<vmem>>, vector<8x128xf32>,
    %31 = vector.extract_strided_slice %28 {offsets = [0, 128], sizes = [8, 128], strides = [1, 1]} : vector<8x512xf32> to vector<8x128xf32>
    %c8_33 = arith.constant 8 : index
    %c256_34 = arith.constant 256 : index
    %32 = vector.load %arg9[%c8_33, %c256_34] : memref<32x512xf32, #tpu.memory_space<vmem>>, vector<8x128xf32>
    tpu.vector_store %arg9[%c8_33, %c256_34], %31 {strides = array<i32>} : memref<32x512xf32, #tpu.memory_space<vmem>>, vector<8x128xf32>,
    %33 = vector.extract_strided_slice %28 {offsets = [0, 256], sizes = [8, 128], strides = [1, 1]} : vector<8x512xf32> to vector<8x128xf32>
    %c16_35 = arith.constant 16 : index
    %c256_36 = arith.constant 256 : index
    %34 = vector.load %arg9[%c16_35, %c256_36] : memref<32x512xf32, #tpu.memory_space<vmem>>, vector<8x128xf32>
    tpu.vector_store %arg9[%c16_35, %c256_36], %33 {strides = array<i32>} : memref<32x512xf32, #tpu.memory_space<vmem>>, vector<8x128xf32>,
    %35 = vector.extract_strided_slice %28 {offsets = [0, 384], sizes = [8, 128], strides = [1, 1]} : vector<8x512xf32> to vector<8x128xf32>
    %c24_37 = arith.constant 24 : index
    %c256_38 = arith.constant 256 : index
    %36 = vector.load %arg9[%c24_37, %c256_38] : memref<32x512xf32, #tpu.memory_space<vmem>>, vector<8x128xf32>
    tpu.vector_store %arg9[%c24_37, %c256_38], %35 {strides = array<i32>} : memref<32x512xf32, #tpu.memory_space<vmem>>, vector<8x128xf32>,
    %c0_39 = arith.constant 0 : index
    %c384 = arith.constant 384 : index
    %37 = vector.load %arg1[%c0_39, %c384] : memref<8x512xf32, #tpu.memory_space<vmem>>, vector<8x128xf32>
    %cst_40 = arith.constant dense<0.000000e+00> : vector<8x512xf32>
    %38 = tpu.matmul %37, %0, %cst_40 {dimension_numbers = #tpu.dot_dimension_numbers<[1], [0], [0], [1], [0, 0, 1, 1], [], []>} : vector<8x128xf32>, vector<128x512xf32>, vector<8x512xf32> -> vector<8x512xf32>
    %39 = vector.extract_strided_slice %38 {offsets = [0, 0], sizes = [8, 128], strides = [1, 1]} : vector<8x512xf32> to vector<8x128xf32>
    %c0_41 = arith.constant 0 : index
    %c384_42 = arith.constant 384 : index
    %40 = vector.load %arg9[%c0_41, %c384_42] : memref<32x512xf32, #tpu.memory_space<vmem>>, vector<8x128xf32>
    tpu.vector_store %arg9[%c0_41, %c384_42], %39 {strides = array<i32>} : memref<32x512xf32, #tpu.memory_space<vmem>>, vector<8x128xf32>,
    %41 = vector.extract_strided_slice %38 {offsets = [0, 128], sizes = [8, 128], strides = [1, 1]} : vector<8x512xf32> to vector<8x128xf32>
    %c8_43 = arith.constant 8 : index
    %c384_44 = arith.constant 384 : index
    %42 = vector.load %arg9[%c8_43, %c384_44] : memref<32x512xf32, #tpu.memory_space<vmem>>, vector<8x128xf32>
    tpu.vector_store %arg9[%c8_43, %c384_44], %41 {strides = array<i32>} : memref<32x512xf32, #tpu.memory_space<vmem>>, vector<8x128xf32>,
    %43 = vector.extract_strided_slice %38 {offsets = [0, 256], sizes = [8, 128], strides = [1, 1]} : vector<8x512xf32> to vector<8x128xf32>
    %c16_45 = arith.constant 16 : index
    %c384_46 = arith.constant 384 : index
    %44 = vector.load %arg9[%c16_45, %c384_46] : memref<32x512xf32, #tpu.memory_space<vmem>>, vector<8x128xf32>
    tpu.vector_store %arg9[%c16_45, %c384_46], %43 {strides = array<i32>} : memref<32x512xf32, #tpu.memory_space<vmem>>, vector<8x128xf32>,
    %45 = vector.extract_strided_slice %38 {offsets = [0, 384], sizes = [8, 128], strides = [1, 1]} : vector<8x512xf32> to vector<8x128xf32>
    %c24_47 = arith.constant 24 : index
    %c384_48 = arith.constant 384 : index
    %46 = vector.load %arg9[%c24_47, %c384_48] : memref<32x512xf32, #tpu.memory_space<vmem>>, vector<8x128xf32>
    tpu.vector_store %arg9[%c24_47, %c384_48], %45 {strides = array<i32>} : memref<32x512xf32, #tpu.memory_space<vmem>>, vector<8x128xf32>,
    %c0_49 = arith.constant 0 : index
    %c0_50 = arith.constant 0 : index
    %47 = vector.load %arg9[%c0_49, %c0_50] : memref<32x512xf32, #tpu.memory_space<vmem>>, vector<32x512xf32>
    %cst_51 = arith.constant dense<0.000000e+00> : vector<32x512xf32>
    %48 = tpu.matmul %1, %47, %cst_51 {dimension_numbers = #tpu.dot_dimension_numbers<[1], [0], [0], [1], [0, 0, 1, 1], [], []>} : vector<32x32xf32>, vector<32x512xf32>, vector<32x512xf32> -> vector<32x512xf32>
    %cst_52 = arith.constant dense<0.000000e+00> : vector<32x2xf32>
    %49 = tpu.matmul %48, %2, %cst_52 {dimension_numbers = #tpu.dot_dimension_numbers<[1], [0], [0], [1], [0, 0, 1, 1], [], []>} : vector<32x512xf32>, vector<512x2xf32>, vector<32x2xf32> -> vector<32x2xf32>
    %cst_53 = arith.constant dense<0.000000e+00> : vector<32x2xf32>
    %50 = tpu.matmul %4, %49, %cst_53 {dimension_numbers = #tpu.dot_dimension_numbers<[1], [0], [0], [1], [0, 0, 1, 1], [], []>} : vector<32x32xf32>, vector<32x2xf32>, vector<32x2xf32> -> vector<32x2xf32>
    %cst_54 = arith.constant 0.001953125 : f32
    %51 = vector.broadcast %cst_54 : f32 to vector<32x2xf32>
    %52 = arith.mulf %50, %51 : vector<32x2xf32>
    %cst_55 = arith.constant dense<0.000000e+00> : vector<32x512xf32>
    %53 = tpu.matmul %52, %3, %cst_55 {dimension_numbers = #tpu.dot_dimension_numbers<[1], [0], [0], [1], [0, 0, 1, 1], [], []>} : vector<32x2xf32>, vector<2x512xf32>, vector<32x512xf32> -> vector<32x512xf32>
    %54 = arith.subf %48, %53 : vector<32x512xf32>
    %55 = arith.mulf %54, %54 : vector<32x512xf32>
    %cst_56 = arith.constant dense<0.000000e+00> : vector<32x2xf32>
    %56 = tpu.matmul %55, %2, %cst_56 {dimension_numbers = #tpu.dot_dimension_numbers<[1], [0], [0], [1], [0, 0, 1, 1], [], []>} : vector<32x512xf32>, vector<512x2xf32>, vector<32x2xf32> -> vector<32x2xf32>
    %cst_57 = arith.constant dense<0.000000e+00> : vector<32x2xf32>
    %57 = tpu.matmul %4, %56, %cst_57 {dimension_numbers = #tpu.dot_dimension_numbers<[1], [0], [0], [1], [0, 0, 1, 1], [], []>} : vector<32x32xf32>, vector<32x2xf32>, vector<32x2xf32> -> vector<32x2xf32>
    %cst_58 = arith.constant 0.001953125 : f32
    %58 = vector.broadcast %cst_58 : f32 to vector<32x2xf32>
    %59 = arith.mulf %57, %58 : vector<32x2xf32>
    %cst_59 = arith.constant 9.99999974E-6 : f32
    %60 = vector.broadcast %cst_59 : f32 to vector<32x2xf32>
    %61 = arith.addf %59, %60 : vector<32x2xf32>
    %62 = math.rsqrt %61 : vector<32x2xf32>
    %63 = vector.broadcast %5 : vector<32x1xf32> to vector<32x2xf32>
    %64 = arith.mulf %62, %63 : vector<32x2xf32>
    %cst_60 = arith.constant dense<0.000000e+00> : vector<32x512xf32>
    %65 = tpu.matmul %64, %3, %cst_60 {dimension_numbers = #tpu.dot_dimension_numbers<[1], [0], [0], [1], [0, 0, 1, 1], [], []>} : vector<32x2xf32>, vector<2x512xf32>, vector<32x512xf32> -> vector<32x512xf32>
    %66 = arith.mulf %54, %65 : vector<32x512xf32>
    %67 = vector.broadcast %6 : vector<32x1xf32> to vector<32x512xf32>
    %68 = arith.addf %66, %67 : vector<32x512xf32>
    %69 = vector.extract_strided_slice %68 {offsets = [0, 0], sizes = [16, 512], strides = [1, 1]} : vector<32x512xf32> to vector<16x512xf32>
    %70 = vector.extract_strided_slice %68 {offsets = [16, 0], sizes = [16, 512], strides = [1, 1]} : vector<32x512xf32> to vector<16x512xf32>
    %71 = arith.addf %69, %70 : vector<16x512xf32>
    %cst_61 = arith.constant 0.000000e+00 : f32
    %72 = vector.broadcast %cst_61 : f32 to vector<16x512xf32>
    %73 = arith.maximumf %71, %72 : vector<16x512xf32>
    %74 = vector.extract_strided_slice %73 {offsets = [0, 0], sizes = [16, 256], strides = [1, 1]} : vector<16x512xf32> to vector<16x256xf32>
    %c0_62 = arith.constant 0 : index
    %c0_63 = arith.constant 0 : index
    %c0_64 = arith.constant 0 : index
    %75 = vector.load %arg8[%c0_62, %c0_63, %c0_64] : memref<2x16x256xf32, #tpu.memory_space<vmem>>, vector<1x16x256xf32>
    %76 = vector.shape_cast %75 : vector<1x16x256xf32> to vector<16x256xf32>
    %77 = vector.shape_cast %74 : vector<16x256xf32> to vector<1x16x256xf32>
    tpu.vector_store %arg8[%c0_62, %c0_63, %c0_64], %77 {strides = array<i32>} : memref<2x16x256xf32, #tpu.memory_space<vmem>>, vector<1x16x256xf32>,
    %78 = vector.extract_strided_slice %73 {offsets = [0, 256], sizes = [16, 256], strides = [1, 1]} : vector<16x512xf32> to vector<16x256xf32>
    %c1_65 = arith.constant 1 : index
    %c0_66 = arith.constant 0 : index
    %c0_67 = arith.constant 0 : index
    %79 = vector.load %arg8[%c1_65, %c0_66, %c0_67] : memref<2x16x256xf32, #tpu.memory_space<vmem>>, vector<1x16x256xf32>
    %80 = vector.shape_cast %79 : vector<1x16x256xf32> to vector<16x256xf32>
    %81 = vector.shape_cast %78 : vector<16x256xf32> to vector<1x16x256xf32>
    tpu.vector_store %arg8[%c1_65, %c0_66, %c0_67], %81 {strides = array<i32>} : memref<2x16x256xf32, #tpu.memory_space<vmem>>, vector<1x16x256xf32>,
    return
  }
  func.func @transform_0(%arg0: i32) -> (i32, i32) {
    %c0_i32 = arith.constant 0 : i32
    %c0_i32_0 = arith.constant 0 : i32
    return %c0_i32, %arg0 : i32, i32
  }
  func.func @transform_1(%arg0: i32) -> (i32, i32) {
    %c0_i32 = arith.constant 0 : i32
    %c0_i32_0 = arith.constant 0 : i32
    %c0_i32_1 = arith.constant 0 : i32
    return %c0_i32, %c0_i32_0 : i32, i32
  }
  func.func @transform_2(%arg0: i32) -> (i32, i32) {
    %c0_i32 = arith.constant 0 : i32
    %c0_i32_0 = arith.constant 0 : i32
    %c0_i32_1 = arith.constant 0 : i32
    return %c0_i32, %c0_i32_0 : i32, i32
  }
  func.func @transform_3(%arg0: i32) -> (i32, i32) {
    %c0_i32 = arith.constant 0 : i32
    %c0_i32_0 = arith.constant 0 : i32
    %c0_i32_1 = arith.constant 0 : i32
    return %c0_i32, %c0_i32_0 : i32, i32
  }
  func.func @transform_4(%arg0: i32) -> (i32, i32) {
    %c0_i32 = arith.constant 0 : i32
    %c0_i32_0 = arith.constant 0 : i32
    %c0_i32_1 = arith.constant 0 : i32
    return %c0_i32, %c0_i32_0 : i32, i32
  }
  func.func @transform_5(%arg0: i32) -> (i32, i32) {
    %c0_i32 = arith.constant 0 : i32
    %c0_i32_0 = arith.constant 0 : i32
    %c0_i32_1 = arith.constant 0 : i32
    return %c0_i32, %c0_i32_0 : i32, i32
  }
  func.func @transform_6(%arg0: i32) -> (i32, i32) {
    %c0_i32 = arith.constant 0 : i32
    %c0_i32_0 = arith.constant 0 : i32
    %c0_i32_1 = arith.constant 0 : i32
    return %c0_i32, %c0_i32_0 : i32, i32
  }
  func.func @transform_7(%arg0: i32) -> (i32, i32, i32) {
    %c0_i32 = arith.constant 0 : i32
    %c0_i32_0 = arith.constant 0 : i32
    %c0_i32_1 = arith.constant 0 : i32
    return %arg0, %c0_i32, %c0_i32_0 : i32, i32, i32
  }
}

</mosaic_0001>

<bundles_post_ra>
// kernel: tpu_custom_call.1
= control target key start
LH: loop header
LB: loop body
LE: loop exit
PB: predicated region body
PF: predicated region fallthrough
CT: control target
= control target key end

     0   :  { %s3692_s0 = inlined_call_operand.hbm [shape: f32[8,1024], index: 0, kind: input, shape index: {}]   ;;  %s3693_s1 = inlined_call_operand.vmem [shape: f32[128,512], index: 1, kind: input, shape index: {}]   ;;  %s3694_s2 = inlined_call_operand.vmem [shape: f32[32,32], index: 2, kind: input, shape index: {}]   ;;  %s3695_s3 = inlined_call_operand.vmem [shape: f32[512,2], index: 3, kind: input, shape index: {}]   ;;  %s3696_s4 = inlined_call_operand.hbm [shape: f32[2,512], index: 4, kind: input, shape index: {}]   ;;  %s3697_s5 = inlined_call_operand.hbm [shape: f32[32,32], index: 5, kind: input, shape index: {}]   ;;  %s3698_s6 = inlined_call_operand.vmem [shape: f32[32,2], index: 6, kind: input, shape index: {}]   ;;  %s3699_s7 = inlined_call_operand.hbm [shape: f32[4,16,256], index: 7, kind: output, shape index: {}]  }
   0x1   :  { %3745 = sst [smem:[#allocation55_spill]] %s3696_s4 }
   0x2   :  { %12 = vsyncpa [#allocation4], 0 }
   0x3   :  { %14 = vsyncpa [#allocation4 + $0x1], 0 }
   0x4   :  { %15 = vsyncpa [#allocation7], 0 }
   0x5   :  { %16 = vsyncpa [#allocation5], 0 }
   0x6   :  { %18 = vsyncpa [#allocation5 + $0x1], 0  ;;  %s2227_s24 = smov 0   ;;  %s2229_s25 = smov 0  }
   0x7   :  { %s2231_s26 = smov 0   ;;  %s2233_s27 = smov 0  }
   0x8 LB: > { %s2248_s28 = sadd.s32 4294967295, %s2177_s27   ;;  %s1833_s29 = sadd.s32 4294967294, %s2177_s27   ;;  %s2177_s27 = sphi %s2233_s27, %s3844_s27   ;;  %s2173_s26 = sphi %s2231_s26, %s3843_s26   ;;  %s2169_s25 = sphi %s2229_s25, %s3842_s25   ;;  %s2165_s24 = sphi %s2227_s24, %s3841_s24  }
   0x9   : > { %p44_p0 = scmp.ne.s32.totalorder %s2169_s25, %s2165_s24  ;;  %p45_p1 = scmp.eq.s32.totalorder %s2248_s28, 0 }
   0xa   : > { %p194_p2 = scmp.eq.s32.totalorder %s2248_s28, 1  ;;  %p200_p3 = scmp.eq.s32.totalorder %s1833_s29, 1 }
   0xb   : > { %p2257_p4 = por %p45_p1, %p44_p0  ;;  %p1834_p5 = scmp.ge.s32.totalorder %s2177_s27, 1 }
   0xc   : > { %p2262_p6 = por %p200_p3, %p44_p0  ;;  %p207_p7 = scmp.lt.s32.totalorder %s2177_s27, 3 }
   0xd   : > { %s3748_s4 = sld [smem:[#allocation55_spill]]  ;;  %s2179_s13 = smov [#allocation6]  }
   0xe   : > { %p2270_p8 = pnand %p1834_p5, %p207_p7  ;;  %s230_s14 = sshll.u32 %s2179_s13, 4  ;;  %s231_s14 = int_to_ptr.vmem [resolvable:$true] %s230_s14 }
   0xf   : > { %s239_s17 = sshll.u32 %s3697_s5, 4  ;;  %s2180_s18 = smov [#allocation8]   ;;  %s240_s17 = int_to_ptr.hbm [resolvable:$true] %s239_s17 }
  0x10   : > { %p1943_p10 = pneg %p2270_p8  ;;  %s241_s19 = sshll.u32 %s2180_s18, 4  ;;  %s242_s19 = int_to_ptr.vmem [resolvable:$true] %s241_s19 }
  0x11   : > { %s2181_s20 = smov 128   ;;  %s2182_s21 = smov 8  }
  0x12   : > { %p1944_p11 = pnand %p1943_p10, %p45_p1  ;;  %s2283_s22 = sadd.s32 1, %s2177_s27  }
  0x13   : > { %s228_s11 = sshll.u32 %s3748_s4, 4  ;;  %s28_s23 = ssub.s32 %s2177_s27, %s2283_s22  ;;  %s229_s11 = int_to_ptr.hbm [resolvable:$true] %s228_s11 }
  0x14   : > { %1946 = dma.hbm_to_vmem [thread:$0]  (!%p1944_p11), %s229_s11, 128, %s231_s14, [#allocation7]  }
  0x15   : > { %1949 = dma.hbm_to_vmem [thread:$0]  (!%p1944_p11), %s240_s17, 512, %s242_s19, [#allocation7], %s2181_s20, %s2181_s20, %s2182_s21  }
  0x16   : > { %p29_p12 = scmp.eq.s32.totalorder %s28_s23, 0  ;;  %s31_s29 = sadd.s32 1, %s2173_s26 }
  0x17   : > { %p38_p13 = scmp.ne.s32.totalorder %s2173_s26, %s2169_s25  ;;  %p39_p0 = scmp.eq.s32.totalorder %s2177_s27, 0 }
  0x18   : > { %s2292_s9 = scalar_select %p29_p12, %s2173_s26, %s31_s29  }
  0x19   : > { %p40_p3 = por %p39_p0, %p38_p13  ;;  %p2296_p5 = por %p194_p2, %p38_p13 }
  0x1a   : > { %p1960_p7 = scmp.lt.s32.totalorder %s2177_s27, 2  ;;  %s258_s11 = sand.u32 1, %s2173_s26  }
  0x1b   : > { %s1838_s13 = sshll.u32 %s258_s11, 5  ;;  %s1920_s14 = sshll.u32 %s2177_s27, 5 }
  0x1c   : > { %s267_s17 = scalar_lea.hbm %s3692_s0, %s1920_s14  ;;  %s262_s18 = scalar_lea.vmem [#allocation3], %s1838_s13 }
  0x1d   : > { %s271_s19 = sshll.u32 %s262_s18, 4  ;;  %s269_s20 = sshll.u32 %s267_s17, 4  ;;  %s272_s19 = int_to_ptr.vmem [resolvable:$true] %s271_s19  ;;  %s270_s20 = int_to_ptr.hbm [resolvable:$true] %s269_s20 }
  0x1e   : > { %p2306_p10 = pnand %p1960_p7, %p40_p3  ;;  %s259_s23 = scalar_lea.sflag [#allocation4], %s258_s11 }
  0x1f   : > { %s2077_s29 = sshra.s32 %s270_s20, 4  ;;  %s2084_s15 = scalar_lea.hbm %s3692_s0, 64  ;;  %s2078_s29 = int_to_ptr.hbm [resolvable:$true] %s2077_s29 }
  0x20   : > { %s2079_s4 = scalar_lea.hbm %s2078_s29, 32  ;;  %p2081_p11 = pneg %p2306_p10 }
  0x21   : > { %p2080_p2 = scmp.ne.s32.totalorder %s2078_s29, %s2079_s4  ;;  %p2085_p0 = scmp.lt.s32.totalorder %s2078_s29, %s3692_s0 }
  0x22   : > { %p2086_p3 = scmp.lt.s32.totalorder %s2084_s15, %s2079_s4 }
  0x23   : > { %p2082_p12 = pnand %p2081_p11, %p2080_p2 }
  0x24   : > { %p2087_p7 = por %p2086_p3, %p2085_p0 }
  0x25   : > { %p2083_p13 = pneg %p2082_p12 }
  0x27   : > { %p2088_p9 = pnand %p2087_p7, %p2083_p13 }
  0x29   : > { %2091 = shalt.err (!%p2088_p9)
}
  0x2a   : > { %1953 = dma.hbm_to_vmem [thread:$0]  (!%p2306_p10), %s270_s20, 512, %s272_s19, %s259_s23  }
  0x2b   : > { %280 = sbr.rel (%p2270_p8) target bundleno = 1371 (0x55b), region = 48 }
  0x30   : > { %s2323_s11 = sand.u32 1, %s2169_s25  }
  0x31   : > { %s1842_s18 = sshll.u32 %s2323_s11, 5  ;;  %s283_s14 = scalar_lea.sflag [#allocation4], %s2323_s11 }
  0x32   : > { %s2327_s13 = scalar_lea.vmem [#allocation3], %s1842_s18 }
  0x33   : > { %2152 = dma.done.wait (%p2257_p4), %s283_s14, 512  }
  0x34   : > { %2154 = vsyncadd (%p2257_p4), %s283_s14, 4294966784 }
  0x35   : > { %2156 = dma.done.wait (%p45_p1), [#allocation7], 640  }
  0x36   : > { %2158 = vsyncadd (%p45_p1), [#allocation7], 4294966656  ;;  %v2340_v0 = vld [vmem:[%s3693_s1 + $0x1f8] sm:$0xff]  ;;  %v2345_v1 = vld [vmem:[%s3693_s1 + $0x1f0] sm:$0xff]  ;;  %vm827_vm0 = vcmask 261120   ;;  %vm1136_vm1 = vcmask 1041408  }
  0x37   : > { %v2350_v2 = vld [vmem:[%s3693_s1 + $0x1d8] sm:$0xff]  ;;  %532 = vmatpush.msra.mxu3 %v2340_v0  ;;  %512 = vmatpush.msra.mxu2 %v2345_v1  ;;  %v2357_v3 = vld [vmem:[%s3693_s1 + $0x1d0] sm:$0xff]  ;;  %v2379_v7 = vld [vmem:[%s3693_s1 + $0x1e8] sm:$0xff]  ;;  %vm1123_vm2 = vcmask 15360   ;;  %s1845_s12 = sshll.u32 %s2323_s11, 6  ;;  %s1922_s20 = sshll.u32 %s2248_s28, 6 }
  0x38   : > { %v2362_v4 = vld [vmem:[%s3693_s1 + $0x1b8] sm:$0xff]  ;;  %v2367_v5 = vld [vmem:[%s3693_s1 + $0x1b0] sm:$0xff]  ;;  %492 = vmatpush.msra.mxu1 %v2379_v7  ;;  %v2390_v9 = vld [vmem:[%s3693_s1 + $0x1e0] sm:$0xff]  ;;  %s3642_s19 = scalar_lea.vmem [#allocation9], %s1845_s12  ;;  %s1737_s23 = scalar_lea.hbm %s3699_s7, %s1922_s20 }
  0x39   : > { %533 = vmatpush.msra.mxu3 %v2350_v2  ;;  %513 = vmatpush.msra.mxu2 %v2357_v3  ;;  %v2374_v6 = vld [vmem:[%s3693_s1 + $0x198] sm:$0xff]  ;;  %v2384_v8 = vld [vmem:[%s3693_s1 + $0x190] sm:$0xff]  ;;  %v2395_v10 = vld [vmem:[%s3693_s1 + $0x1c8] sm:$0xff]  ;;  %s1738_s30 = sshll.u32 %s3642_s19, 4  ;;  %s1740_s29 = sshll.u32 %s1737_s23, 4  ;;  %s1739_s30 = int_to_ptr.vmem [resolvable:$true] %s1738_s30  ;;  %s1741_s29 = int_to_ptr.hbm [resolvable:$true] %s1740_s29 }
  0x3a   : > { %v2402_v11 = vld [vmem:[%s3693_s1 + $0x1c0] sm:$0xff]  ;;  %v2407_v12 = vld [vmem:[%s3693_s1 + $0x1a8] sm:$0xff]  ;;  %v2412_v13 = vld [vmem:[%s3693_s1 + $0x178] sm:$0xff]  ;;  %472 = vmatpush.msra.mxu0 %v2390_v9  ;;  %493 = vmatpush.msra.mxu1 %v2395_v10  ;;  %s1725_s15 = scalar_lea.sflag [#allocation5], %s2323_s11  ;;  %s2121_s16 = sshra.s32 %s1741_s29, 4  ;;  %s2122_s16 = int_to_ptr.hbm [resolvable:$true] %s2121_s16 }
  0x3b   : > { %534 = vmatpush.msra.mxu3 %v2362_v4  ;;  %514 = vmatpush.msra.mxu2 %v2367_v5  ;;  %v2417_v14 = vld [vmem:[%s3693_s1 + $0x170] sm:$0xff]  ;;  %v2426_v15 = vld [vmem:[%s3693_s1 + $0x1a0] sm:$0xff]  ;;  %v2431_v16 = vld [vmem:[%s3693_s1 + $0x188] sm:$0xff]  ;;  %s2123_s17 = scalar_lea.hbm %s2122_s16, 64  ;;  %s2127_s14 = scalar_lea.hbm %s3699_s7, 128 }
  0x3c   : > { %v2436_v17 = vld [vmem:[%s3693_s1 + $0x158] sm:$0xff]  ;;  %v2441_v18 = vld [vmem:[%s3693_s1 + $0x150] sm:$0xff]  ;;  %473 = vmatpush.msra.mxu0 %v2402_v11  ;;  %494 = vmatpush.msra.mxu1 %v2407_v12  ;;  %v2450_v19 = vld [vmem:[%s3693_s1 + $0x180] sm:$0xff]  ;;  %p2124_p1 = scmp.ne.s32.totalorder %s2122_s16, %s2123_s17  ;;  %p2128_p9 = scmp.lt.s32.totalorder %s2122_s16, %s3699_s7 }
  0x3d   : > { %535 = vmatpush.msra.mxu3 %v2374_v6  ;;  %515 = vmatpush.msra.mxu2 %v2384_v8  ;;  %v2455_v20 = vld [vmem:[%s3693_s1 + $0x168] sm:$0xff]  ;;  %v2460_v21 = vld [vmem:[%s3693_s1 + $0x138] sm:$0xff]  ;;  %v2465_v22 = vld [vmem:[%s3693_s1 + $0x130] sm:$0xff]  ;;  %p2129_p10 = scmp.lt.s32.totalorder %s2127_s14, %s2123_s17 }
  0x3e   : > { %474 = vmatpush.msra.mxu0 %v2426_v15  ;;  %495 = vmatpush.msra.mxu1 %v2431_v16  ;;  %v2474_v23 = vld [vmem:[%s3693_s1 + $0x160] sm:$0xff]  ;;  %v2479_v24 = vld [vmem:[%s3693_s1 + $0x148] sm:$0xff]  ;;  %v2484_v25 = vld [vmem:[%s3693_s1 + $0x118] sm:$0xff]  ;;  %p2125_p4 = pnand %p2124_p1, %p2296_p5 }
  0x3f   : > { %536 = vmatpush.msra.mxu3 %v2412_v13  ;;  %516 = vmatpush.msra.mxu2 %v2417_v14  ;;  %v2489_v26 = vld [vmem:[%s3693_s1 + $0x110] sm:$0xff]  ;;  %v2498_v27 = vld [vmem:[%s3693_s1 + $0x140] sm:$0xff]  ;;  %v2503_v28 = vld [vmem:[%s3693_s1 + $0x128] sm:$0xff]  ;;  %p2130_p2 = por %p2129_p10, %p2128_p9 }
  0x40   : > { %475 = vmatpush.msra.mxu0 %v2450_v19  ;;  %496 = vmatpush.msra.mxu1 %v2455_v20  ;;  %v2508_v29 = vld [vmem:[%s3693_s1 + $0xf8] sm:$0xff]  ;;  %v2513_v30 = vld [vmem:[%s3693_s1 + $0xf0] sm:$0xff]  ;;  %v2522_v31 = vld [vmem:[%s3693_s1 + $0x120] sm:$0xff]  ;;  %p2126_p8 = pneg %p2125_p4 }
  0x41   : > { %537 = vmatpush.msra.mxu3 %v2436_v17  ;;  %517 = vmatpush.msra.mxu2 %v2441_v18  ;;  %3752 = vst [vmem:[#allocation13_spill] sm:$0xff] %v2522_v31  ;;  %v2527_v32 = vld [vmem:[%s3693_s1 + $0x108] sm:$0xff]  ;;  %v2532_v33 = vld [vmem:[%s3693_s1 + $0xd8] sm:$0xff]  ;;  %v2537_v34 = vld [vmem:[%s3693_s1 + $0xd0] sm:$0xff] }
  0x42   : > { %476 = vmatpush.msra.mxu0 %v2474_v23  ;;  %497 = vmatpush.msra.mxu1 %v2479_v24  ;;  %3753 = vst [vmem:[#allocation14_spill] sm:$0xff] %v2527_v32  ;;  %v2546_v35 = vld [vmem:[%s3693_s1 + $0x100] sm:$0xff]  ;;  %v2551_v36 = vld [vmem:[%s3693_s1 + $0xe8] sm:$0xff]  ;;  %v2556_v37 = vld [vmem:[%s3693_s1 + $0xb8] sm:$0xff]  ;;  %p2131_p11 = pnand %p2130_p2, %p2126_p8 }
  0x43   : > { %538 = vmatpush.msra.mxu3 %v2460_v21  ;;  %518 = vmatpush.msra.mxu2 %v2465_v22  ;;  %v2561_v38 = vld [vmem:[%s3693_s1 + $0xb0] sm:$0xff]  ;;  %v2570_v39 = vld [vmem:[%s3693_s1 + $0xe0] sm:$0xff]  ;;  %v2575_v40 = vld [vmem:[%s3693_s1 + $0xc8] sm:$0xff] }
  0x44   : > { %477 = vmatpush.msra.mxu0 %v2498_v27  ;;  %498 = vmatpush.msra.mxu1 %v2503_v28  ;;  %v2580_v41 = vld [vmem:[%s3693_s1 + $0x98] sm:$0xff]  ;;  %v2585_v42 = vld [vmem:[%s3693_s1 + $0x90] sm:$0xff]  ;;  %v2594_v43 = vld [vmem:[%s3693_s1 + $0xc0] sm:$0xff] }
  0x45   : > { %539 = vmatpush.msra.mxu3 %v2484_v25  ;;  %519 = vmatpush.msra.mxu2 %v2489_v26  ;;  %v2599_v44 = vld [vmem:[%s3693_s1 + $0xa8] sm:$0xff]  ;;  %v2604_v45 = vld [vmem:[%s3693_s1 + $0x78] sm:$0xff]  ;;  %v2609_v46 = vld [vmem:[%s3693_s1 + $0x70] sm:$0xff] }
  0x46   : > { %478 = vmatpush.msra.mxu0 %v2522_v31  ;;  %499 = vmatpush.msra.mxu1 %v2527_v32  ;;  %v2618_v47 = vld [vmem:[%s3693_s1 + $0xa0] sm:$0xff]  ;;  %v2623_v48 = vld [vmem:[%s3693_s1 + $0x88] sm:$0xff]  ;;  %v2628_v49 = vld [vmem:[%s3693_s1 + $0x58] sm:$0xff] }
  0x47   : > { %540 = vmatpush.msra.mxu3 %v2508_v29  ;;  %520 = vmatpush.msra.mxu2 %v2513_v30  ;;  %v2633_v50 = vld [vmem:[%s3693_s1 + $0x50] sm:$0xff]  ;;  %v2642_v51 = vld [vmem:[%s3693_s1 + $0x80] sm:$0xff]  ;;  %v2647_v52 = vld [vmem:[%s3693_s1 + $0x68] sm:$0xff] }
  0x48   : > { %479 = vmatpush.msra.mxu0 %v2546_v35  ;;  %500 = vmatpush.msra.mxu1 %v2551_v36  ;;  %v2652_v53 = vld [vmem:[%s3693_s1 + $0x38] sm:$0xff]  ;;  %v2657_v54 = vld [vmem:[%s3693_s1 + $0x30] sm:$0xff]  ;;  %v2666_v55 = vld [vmem:[%s3693_s1 + $0x60] sm:$0xff] }
  0x49   : > { %541 = vmatpush.msra.mxu3 %v2532_v33  ;;  %521 = vmatpush.msra.mxu2 %v2537_v34  ;;  %v2671_v56 = vld [vmem:[%s3693_s1 + $0x48] sm:$0xff]  ;;  %v2676_v57 = vld [vmem:[%s3693_s1 + $0x18] sm:$0xff]  ;;  %v2681_v58 = vld [vmem:[%s3693_s1 + $0x10] sm:$0xff] }
  0x4a   : > { %480 = vmatpush.msra.mxu0 %v2570_v39  ;;  %501 = vmatpush.msra.mxu1 %v2575_v40  ;;  %v2692_v59 = vld [vmem:[%s3693_s1 + $0x40] sm:$0xff]  ;;  %v2697_v60 = vld [vmem:[%s3693_s1 + $0x28] sm:$0xff] }
  0x4b   : > { %542 = vmatpush.msra.mxu3 %v2556_v37  ;;  %522 = vmatpush.msra.mxu2 %v2561_v38  ;;  %v2706_v61 = vld [vmem:[%s3693_s1 + $0x20] sm:$0xff]  ;;  %v2711_v62 = vld [vmem:[%s3693_s1 + $0x8] sm:$0xff] }
  0x4c   : > { %481 = vmatpush.msra.mxu0 %v2594_v43  ;;  %502 = vmatpush.msra.mxu1 %v2599_v44  ;;  %v2720_v63 = vld [vmem:[%s3693_s1] sm:$0xff] }
  0x4d   : > { %543 = vmatpush.msra.mxu3 %v2580_v41  ;;  %523 = vmatpush.msra.mxu2 %v2585_v42 }
  0x4e   : > { %482 = vmatpush.msra.mxu0 %v2618_v47  ;;  %503 = vmatpush.msra.mxu1 %v2623_v48 }
  0x4f   : > { %544 = vmatpush.msra.mxu3 %v2604_v45  ;;  %524 = vmatpush.msra.mxu2 %v2609_v46 }
  0x50   : > { %483 = vmatpush.msra.mxu0 %v2642_v51  ;;  %504 = vmatpush.msra.mxu1 %v2647_v52 }
  0x51   : > { %545 = vmatpush.msra.mxu3 %v2628_v49  ;;  %525 = vmatpush.msra.mxu2 %v2633_v50 }
  0x52   : > { %484 = vmatpush.msra.mxu0 %v2666_v55  ;;  %505 = vmatpush.msra.mxu1 %v2671_v56 }
  0x53   : > { %546 = vmatpush.msra.mxu3 %v2652_v53  ;;  %526 = vmatpush.msra.mxu2 %v2657_v54 }
  0x54   : > { %485 = vmatpush.msra.mxu0 %v2692_v59  ;;  %506 = vmatpush.msra.mxu1 %v2697_v60 }
  0x55   : > { %547 = vmatpush.msra.mxu3 %v2676_v57  ;;  %527 = vmatpush.msra.mxu2 %v2681_v58 }
  0x56   : > { %486 = vmatpush.msra.mxu0 %v2706_v61  ;;  %507 = vmatpush.msra.mxu1 %v2711_v62 }
  0x57   : > { %617 = vmatpush.msrb.mxu3 %v2340_v0  ;;  %597 = vmatpush.msrb.mxu2 %v2345_v1 }
  0x58   : > { %577 = vmatpush.msrb.mxu1 %v2379_v7  ;;  %487 = vmatpush.msra.mxu0 %v2720_v63 }
  0x59   : > { %618 = vmatpush.msrb.mxu3 %v2350_v2  ;;  %598 = vmatpush.msrb.mxu2 %v2357_v3 }
  0x5a   : > { %557 = vmatpush.msrb.mxu0 %v2390_v9  ;;  %578 = vmatpush.msrb.mxu1 %v2395_v10 }
  0x5b   : > { %619 = vmatpush.msrb.mxu3 %v2362_v4  ;;  %599 = vmatpush.msrb.mxu2 %v2367_v5 }
  0x5c   : > { %558 = vmatpush.msrb.mxu0 %v2402_v11  ;;  %579 = vmatpush.msrb.mxu1 %v2407_v12 }
  0x5d   : > { %620 = vmatpush.msrb.mxu3 %v2374_v6  ;;  %600 = vmatpush.msrb.mxu2 %v2384_v8 }
  0x5e   : > { %559 = vmatpush.msrb.mxu0 %v2426_v15  ;;  %580 = vmatpush.msrb.mxu1 %v2431_v16 }
  0x5f   : > { %621 = vmatpush.msrb.mxu3 %v2412_v13  ;;  %601 = vmatpush.msrb.mxu2 %v2417_v14 }
  0x60   : > { %560 = vmatpush.msrb.mxu0 %v2450_v19  ;;  %581 = vmatpush.msrb.mxu1 %v2455_v20 }
  0x61   : > { %622 = vmatpush.msrb.mxu3 %v2436_v17  ;;  %602 = vmatpush.msrb.mxu2 %v2441_v18 }
  0x62   : > { %561 = vmatpush.msrb.mxu0 %v2474_v23  ;;  %582 = vmatpush.msrb.mxu1 %v2479_v24 }
  0x63   : > { %623 = vmatpush.msrb.mxu3 %v2460_v21  ;;  %603 = vmatpush.msrb.mxu2 %v2465_v22 }
  0x64   : > { %562 = vmatpush.msrb.mxu0 %v2498_v27  ;;  %583 = vmatpush.msrb.mxu1 %v2503_v28 }
  0x65   : > { %624 = vmatpush.msrb.mxu3 %v2484_v25  ;;  %604 = vmatpush.msrb.mxu2 %v2489_v26 }
  0x66   : > { %563 = vmatpush.msrb.mxu0 %v2522_v31  ;;  %584 = vmatpush.msrb.mxu1 %v2527_v32  ;;  %v471_v31 = vld [vmem:[%s2327_s13] sm:$0xff] }
  0x67   : > { %625 = vmatpush.msrb.mxu3 %v2508_v29  ;;  %605 = vmatpush.msrb.mxu2 %v2513_v30 }
  0x68   : > { %564 = vmatpush.msrb.mxu0 %v2546_v35  ;;  %585 = vmatpush.msrb.mxu1 %v2551_v36 }
  0x69   : > { %626 = vmatpush.msrb.mxu3 %v2532_v33  ;;  %606 = vmatpush.msrb.mxu2 %v2537_v34 }
  0x6a   : > { %565 = vmatpush.msrb.mxu0 %v2570_v39  ;;  %586 = vmatpush.msrb.mxu1 %v2575_v40 }
  0x6b   : > { %627 = vmatpush.msrb.mxu3 %v2556_v37  ;;  %607 = vmatpush.msrb.mxu2 %v2561_v38 }
  0x6c   : > { %566 = vmatpush.msrb.mxu0 %v2594_v43  ;;  %587 = vmatpush.msrb.mxu1 %v2599_v44 }
  0x6d   : > { %628 = vmatpush.msrb.mxu3 %v2580_v41  ;;  %608 = vmatpush.msrb.mxu2 %v2585_v42 }
  0x6e   : > { %548 = vmatmul.f32.vlgmr.msra.gmra.mxu3 %v471_v31  ;;  %567 = vmatpush.msrb.mxu0 %v2618_v47 }
  0x6f   : > { %629 = vmatpush.msrb.mxu3 %v2604_v45  ;;  %609 = vmatpush.msrb.mxu2 %v2609_v46 }
  0x70   : > { %588 = vmatpush.msrb.mxu1 %v2623_v48  ;;  %528 = vmatmul.f32.vlgmr.msra.gmra.mxu2 %v471_v31 }
  0x71   : > { %630 = vmatpush.msrb.mxu3 %v2628_v49  ;;  %610 = vmatpush.msrb.mxu2 %v2633_v50 }
  0x72   : > { %568 = vmatpush.msrb.mxu0 %v2642_v51  ;;  %589 = vmatpush.msrb.mxu1 %v2647_v52 }
  0x73   : > { %631 = vmatpush.msrb.mxu3 %v2652_v53  ;;  %611 = vmatpush.msrb.mxu2 %v2657_v54 }
  0x74   : > { %569 = vmatpush.msrb.mxu0 %v2666_v55  ;;  %590 = vmatpush.msrb.mxu1 %v2671_v56 }
  0x75   : > { %632 = vmatpush.msrb.mxu3 %v2676_v57  ;;  %612 = vmatpush.msrb.mxu2 %v2681_v58 }
  0x76   : > { %570 = vmatpush.msrb.mxu0 %v2692_v59  ;;  %591 = vmatpush.msrb.mxu1 %v2697_v60 }
  0x77   : > { %702 = vmatpush.msra.mxu3 %v2340_v0  ;;  %682 = vmatpush.msra.mxu2 %v2345_v1 }
  0x78   : > { %571 = vmatpush.msrb.mxu0 %v2706_v61  ;;  %592 = vmatpush.msrb.mxu1 %v2711_v62 }
  0x79   : > { %703 = vmatpush.msra.mxu3 %v2350_v2  ;;  %683 = vmatpush.msra.mxu2 %v2357_v3 }
  0x7a   : > { %508 = vmatmul.f32.vlgmr.msra.gmra.mxu1 %v471_v31  ;;  %572 = vmatpush.msrb.mxu0 %v2720_v63 }
  0x7b   : > { %704 = vmatpush.msra.mxu3 %v2362_v4  ;;  %684 = vmatpush.msra.mxu2 %v2367_v5 }
  0x7c   : > { %662 = vmatpush.msra.mxu1 %v2379_v7  ;;  %488 = vmatmul.f32.vlgmr.msra.gmra.mxu0 %v471_v31  ;;  %v3754_v31 = vld [vmem:[#allocation13_spill] sm:$0xff] }
  0x7d   : > { %705 = vmatpush.msra.mxu3 %v2374_v6  ;;  %685 = vmatpush.msra.mxu2 %v2384_v8 }
  0x7e   : > { %663 = vmatpush.msra.mxu1 %v2395_v10  ;;  %642 = vmatpush.msra.mxu0 %v2390_v9 }
  0x7f   : > { %706 = vmatpush.msra.mxu3 %v2412_v13  ;;  %686 = vmatpush.msra.mxu2 %v2417_v14 }
  0x80   : > { %664 = vmatpush.msra.mxu1 %v2407_v12  ;;  %643 = vmatpush.msra.mxu0 %v2402_v11 }
  0x81   : > { %707 = vmatpush.msra.mxu3 %v2436_v17  ;;  %687 = vmatpush.msra.mxu2 %v2441_v18 }
  0x82   : > { %665 = vmatpush.msra.mxu1 %v2431_v16  ;;  %644 = vmatpush.msra.mxu0 %v2426_v15 }
  0x83   : > { %708 = vmatpush.msra.mxu3 %v2460_v21  ;;  %688 = vmatpush.msra.mxu2 %v2465_v22 }
  0x84   : > { %666 = vmatpush.msra.mxu1 %v2455_v20  ;;  %645 = vmatpush.msra.mxu0 %v2450_v19 }
  0x85   : > { %709 = vmatpush.msra.mxu3 %v2484_v25  ;;  %689 = vmatpush.msra.mxu2 %v2489_v26 }
  0x86   : > { %667 = vmatpush.msra.mxu1 %v2479_v24  ;;  %646 = vmatpush.msra.mxu0 %v2474_v23 }
  0x87   : > { %710 = vmatpush.msra.mxu3 %v2508_v29  ;;  %690 = vmatpush.msra.mxu2 %v2513_v30 }
  0x88   : > { %668 = vmatpush.msra.mxu1 %v2503_v28  ;;  %647 = vmatpush.msra.mxu0 %v2498_v27 }
  0x89   : > { %711 = vmatpush.msra.mxu3 %v2532_v33  ;;  %691 = vmatpush.msra.mxu2 %v2537_v34 }
  0x8a   : > { %669 = vmatpush.msra.mxu1 %v2527_v32  ;;  %648 = vmatpush.msra.mxu0 %v3754_v31  ;;  %v556_v32 = vld [vmem:[%s2327_s13 + $0x8] sm:$0xff] }
  0x8b   : > { %712 = vmatpush.msra.mxu3 %v2556_v37  ;;  %692 = vmatpush.msra.mxu2 %v2561_v38 }
  0x8c   : > { %670 = vmatpush.msra.mxu1 %v2551_v36  ;;  %649 = vmatpush.msra.mxu0 %v2546_v35 }
  0x8d   : > { %713 = vmatpush.msra.mxu3 %v2580_v41  ;;  %693 = vmatpush.msra.mxu2 %v2585_v42 }
  0x8e   : > { %671 = vmatpush.msra.mxu1 %v2575_v40  ;;  %650 = vmatpush.msra.mxu0 %v2570_v39 }
  0x8f   : > { %714 = vmatpush.msra.mxu3 %v2604_v45  ;;  %694 = vmatpush.msra.mxu2 %v2609_v46 }
  0x90   : > { %672 = vmatpush.msra.mxu1 %v2599_v44  ;;  %651 = vmatpush.msra.mxu0 %v2594_v43 }
  0x91   : > { %715 = vmatpush.msra.mxu3 %v2628_v49  ;;  %695 = vmatpush.msra.mxu2 %v2633_v50 }
  0x92   : > { %673 = vmatpush.msra.mxu1 %v2623_v48  ;;  %633 = vmatmul.f32.vlgmr.msrb.gmra.mxu3 %v556_v32 }
  0x93   : > { %716 = vmatpush.msra.mxu3 %v2652_v53  ;;  %696 = vmatpush.msra.mxu2 %v2657_v54 }
  0x94   : > { %652 = vmatpush.msra.mxu0 %v2618_v47  ;;  %613 = vmatmul.f32.vlgmr.msrb.gmra.mxu2 %v556_v32 }
  0x95   : > { %717 = vmatpush.msra.mxu3 %v2676_v57  ;;  %697 = vmatpush.msra.mxu2 %v2681_v58 }
  0x96   : > { %653 = vmatpush.msra.mxu0 %v2642_v51  ;;  %674 = vmatpush.msra.mxu1 %v2647_v52 }
  0x97   : > { %787 = vmatpush.msrb.mxu3 %v2340_v0  ;;  %767 = vmatpush.msrb.mxu2 %v2345_v1  ;;  %v641_v0 = vld [vmem:[%s2327_s13 + $0x10] sm:$0xff] }
  0x98   : > { %654 = vmatpush.msra.mxu0 %v2666_v55  ;;  %675 = vmatpush.msra.mxu1 %v2671_v56  ;;  %v3755_v1 = vld [vmem:[#allocation14_spill] sm:$0xff] }
  0x99   : > { %788 = vmatpush.msrb.mxu3 %v2350_v2  ;;  %768 = vmatpush.msrb.mxu2 %v2357_v3  ;;  %v726_v2 = vld [vmem:[%s2327_s13 + $0x18] sm:$0xff] }
  0x9a   : > { %655 = vmatpush.msra.mxu0 %v2692_v59  ;;  %676 = vmatpush.msra.mxu1 %v2697_v60 }
  0x9b   : > { %789 = vmatpush.msrb.mxu3 %v2362_v4  ;;  %769 = vmatpush.msrb.mxu2 %v2367_v5 }
  0x9c   : > { %656 = vmatpush.msra.mxu0 %v2706_v61  ;;  %677 = vmatpush.msra.mxu1 %v2711_v62 }
  0x9d   : > { %790 = vmatpush.msrb.mxu3 %v2374_v6  ;;  %770 = vmatpush.msrb.mxu2 %v2384_v8 }
  0x9e   : > { %657 = vmatpush.msra.mxu0 %v2720_v63  ;;  %593 = vmatmul.f32.vlgmr.msrb.gmra.mxu1 %v556_v32 }
  0x9f   : > { %791 = vmatpush.msrb.mxu3 %v2412_v13  ;;  %771 = vmatpush.msrb.mxu2 %v2417_v14  ;;  %v2934_v13 = vld [vmem:[%s3694_s2 + $0x10] sm:$0xff] }
  0xa0   : > { %747 = vmatpush.msrb.mxu1 %v2379_v7  ;;  %573 = vmatmul.f32.vlgmr.msrb.gmra.mxu0 %v556_v32 }
  0xa1   : > { %792 = vmatpush.msrb.mxu3 %v2436_v17  ;;  %772 = vmatpush.msrb.mxu2 %v2441_v18  ;;  %v2943_v18 = vld [vmem:[%s3694_s2 + $0x18] sm:$0xff] }
  0xa2   : > { %727 = vmatpush.msrb.mxu0 %v2390_v9  ;;  %748 = vmatpush.msrb.mxu1 %v2395_v10 }
  0xa3   : > { %793 = vmatpush.msrb.mxu3 %v2460_v21  ;;  %773 = vmatpush.msrb.mxu2 %v2465_v22  ;;  %v2958_v21 = vld [vmem:[%s3695_s3 + $0x170] sm:$0xff]  ;;  %v2964_v22 = vld [vmem:[%s3695_s3 + $0x78] sm:$0xff] }
  0xa4   : > { %728 = vmatpush.msrb.mxu0 %v2402_v11  ;;  %749 = vmatpush.msrb.mxu1 %v2407_v12  ;;  %v394_v11 = vld [vmem:[%s3694_s2] sm:$0xff]  ;;  %v2925_v12 = vld [vmem:[%s3694_s2 + $0x8] sm:$0xff] }
  0xa5   : > { %794 = vmatpush.msrb.mxu3 %v2484_v25  ;;  %774 = vmatpush.msrb.mxu2 %v2489_v26  ;;  %v2976_v25 = vld [vmem:[%s3695_s3 + $0x168] sm:$0xff]  ;;  %v2981_v26 = vld [vmem:[%s3695_s3 + $0x70] sm:$0xff] }
  0xa6   : > { %729 = vmatpush.msrb.mxu0 %v2426_v15  ;;  %750 = vmatpush.msrb.mxu1 %v2431_v16 }
  0xa7   : > { %795 = vmatpush.msrb.mxu3 %v2508_v29  ;;  %775 = vmatpush.msrb.mxu2 %v2513_v30  ;;  %v2999_v30 = vld [vmem:[%s3695_s3 + $0xe8] sm:$0xff] }
  0xa8   : > { %730 = vmatpush.msrb.mxu0 %v2450_v19  ;;  %751 = vmatpush.msrb.mxu1 %v2455_v20  ;;  %v2953_v20 = vld [vmem:[%s3695_s3 + $0x178] sm:$0xff] }
  0xa9   : > { %796 = vmatpush.msrb.mxu3 %v2532_v33  ;;  %776 = vmatpush.msrb.mxu2 %v2537_v34  ;;  %v3005_v33 = vld [vmem:[%s3695_s3 + $0x160] sm:$0xff]  ;;  %v3010_v34 = vld [vmem:[%s3695_s3 + $0x1f8] sm:$0xff] }
  0xaa   : > { %731 = vmatpush.msrb.mxu0 %v2474_v23  ;;  %752 = vmatpush.msrb.mxu1 %v2479_v24  ;;  %v2969_v23 = vld [vmem:[%s3695_s3 + $0xf8] sm:$0xff] }
  0xab   : > { %797 = vmatpush.msrb.mxu3 %v2556_v37  ;;  %777 = vmatpush.msrb.mxu2 %v2561_v38  ;;  %v3029_v37 = vld [vmem:[%s3695_s3 + $0xe0] sm:$0xff]  ;;  %v3035_v38 = vld [vmem:[%s3695_s3 + $0x1f0] sm:$0xff] }
  0xac   : > { %732 = vmatpush.msrb.mxu0 %v2498_v27  ;;  %753 = vmatpush.msrb.mxu1 %v2503_v28  ;;  %v2986_v27 = vld [vmem:[%s3695_s3 + $0xf0] sm:$0xff]  ;;  %v2992_v28 = vld [vmem:[%s3695_s3 + $0x68] sm:$0xff] }
  0xad   : > { %798 = vmatpush.msrb.mxu3 %v2580_v41  ;;  %778 = vmatpush.msrb.mxu2 %v2585_v42  ;;  %v3053_v41 = vld [vmem:[%s3695_s3 + $0xd8] sm:$0xff]  ;;  %v3058_v42 = vld [vmem:[%s3695_s3 + $0x1e8] sm:$0xff] }
  0xae   : > { %718 = vmatmul.f32.vlgmr.msra.gmra.mxu3 %v641_v0  ;;  %733 = vmatpush.msrb.mxu0 %v3754_v31  ;;  %v3199_v31 = vld [vmem:[%s3695_s3 + $0x120] sm:$0xff] }
  0xaf   : > { %754 = vmatpush.msrb.mxu1 %v3755_v1  ;;  %799 = vmatpush.msrb.mxu3 %v2604_v45  ;;  %v3077_v45 = vld [vmem:[%s3695_s3 + $0xd0] sm:$0xff] }
  0xb0   : > { %698 = vmatmul.f32.vlgmr.msra.gmra.mxu2 %v641_v0  ;;  %734 = vmatpush.msrb.mxu0 %v2546_v35  ;;  %v3017_v35 = vld [vmem:[%s3695_s3 + $0x60] sm:$0xff]  ;;  %v3211_v1 = vld [vmem:[%s3695_s3 + $0x1b0] sm:$0xff] }
  0xb1   : > { %755 = vmatpush.msrb.mxu1 %v2551_v36  ;;  %779 = vmatpush.msrb.mxu2 %v2609_v46  ;;  %v3024_v36 = vld [vmem:[%s3695_s3 + $0x158] sm:$0xff]  ;;  %v3082_v46 = vld [vmem:[%s3695_s3 + $0x1e0] sm:$0xff]  ;;  %3764 = vst [vmem:[#allocation21_spill] sm:$0xff] %v3211_v1 }
  0xb2   : > { %800 = vmatpush.msrb.mxu3 %v2628_v49  ;;  %735 = vmatpush.msrb.mxu0 %v2570_v39  ;;  %v3041_v39 = vld [vmem:[%s3695_s3 + $0x58] sm:$0xff]  ;;  %v3103_v49 = vld [vmem:[%s3695_s3 + $0x48] sm:$0xff] }
  0xb3   : > { %756 = vmatpush.msrb.mxu1 %v2575_v40  ;;  %780 = vmatpush.msrb.mxu2 %v2633_v50  ;;  %v3048_v40 = vld [vmem:[%s3695_s3 + $0x150] sm:$0xff]  ;;  %v3111_v50 = vld [vmem:[%s3695_s3 + $0xc8] sm:$0xff] }
  0xb4   : > { %801 = vmatpush.msrb.mxu3 %v2652_v53  ;;  %736 = vmatpush.msrb.mxu0 %v2594_v43  ;;  %v3065_v43 = vld [vmem:[%s3695_s3 + $0x50] sm:$0xff]  ;;  %v3129_v53 = vld [vmem:[%s3695_s3 + $0x40] sm:$0xff] }
  0xb5   : > { %757 = vmatpush.msrb.mxu1 %v2599_v44  ;;  %781 = vmatpush.msrb.mxu2 %v2657_v54  ;;  %v3072_v44 = vld [vmem:[%s3695_s3 + $0x148] sm:$0xff]  ;;  %v3136_v54 = vld [vmem:[%s3695_s3 + $0xc0] sm:$0xff] }
  0xb6   : > { %802 = vmatpush.msrb.mxu3 %v2676_v57  ;;  %737 = vmatpush.msrb.mxu0 %v2618_v47  ;;  %v3091_v47 = vld [vmem:[%s3695_s3 + $0x140] sm:$0xff]  ;;  %3756 = vst [vmem:[#allocation13_spill] sm:$0xff] %v3136_v54  ;;  %v3153_v57 = vld [vmem:[%s3695_s3 + $0x38] sm:$0xff] }
  0xb7   : > { %803 = vmatmul.f32.vlgmr.msrb.gmra.mxu3 %v726_v2  ;;  %758 = vmatpush.msrb.mxu1 %v2623_v48  ;;  %v3096_v48 = vld [vmem:[%s3695_s3 + $0x1d8] sm:$0xff]  ;;  %3757 = vst [vmem:[#allocation14_spill] sm:$0xff] %v3153_v57 }
  0xb8   : > { %782 = vmatpush.msrb.mxu2 %v2681_v58  ;;  %678 = vmatmul.f32.vlgmr.msra.gmra.mxu1 %v641_v0  ;;  %v3160_v58 = vld [vmem:[%s3695_s3 + $0xb8] sm:$0xff] }
  0xb9   : > { %783 = vmatmul.f32.vlgmr.msrb.gmra.mxu2 %v726_v2  ;;  %738 = vmatpush.msrb.mxu0 %v2642_v51  ;;  %v3116_v51 = vld [vmem:[%s3695_s3 + $0x138] sm:$0xff]  ;;  %3758 = vst [vmem:[#allocation15_spill] sm:$0xff] %v3160_v58 }
  0xba   : > { %759 = vmatpush.msrb.mxu1 %v2647_v52  ;;  %658 = vmatmul.f32.vlgmr.msra.gmra.mxu0 %v641_v0  ;;  %v3123_v52 = vld [vmem:[%s3695_s3 + $0x1d0] sm:$0xff]  ;;  %v3204_v0 = vld [vmem:[%s3695_s3 + $0x28] sm:$0xff] }
  0xbb   : > { %739 = vmatpush.msrb.mxu0 %v2666_v55  ;;  %v3141_v55 = vld [vmem:[%s3695_s3 + $0x130] sm:$0xff]  ;;  %3763 = vst [vmem:[#allocation20_spill] sm:$0xff] %v3204_v0 }
  0xbc   : > { %760 = vmatpush.msrb.mxu1 %v2671_v56  ;;  %v3146_v56 = vld [vmem:[%s3695_s3 + $0x1c8] sm:$0xff] }
  0xbd   : > { %740 = vmatpush.msrb.mxu0 %v2692_v59  ;;  %v3165_v59 = vld [vmem:[%s3695_s3 + $0x128] sm:$0xff] }
  0xbe   : > { %761 = vmatpush.msrb.mxu1 %v2697_v60  ;;  %v3170_v60 = vld [vmem:[%s3695_s3 + $0x1c0] sm:$0xff] }
  0xbf   : > { %741 = vmatpush.msrb.mxu0 %v2706_v61  ;;  %3759 = vst [vmem:[#allocation16_spill] sm:$0xff] %v3170_v60  ;;  %v3179_v61 = vld [vmem:[%s3695_s3 + $0x30] sm:$0xff] }
  0xc0   : > { %762 = vmatpush.msrb.mxu1 %v2711_v62  ;;  %3760 = vst [vmem:[#allocation17_spill] sm:$0xff] %v3179_v61  ;;  %v3184_v62 = vld [vmem:[%s3695_s3 + $0x1b8] sm:$0xff] }
  0xc1   : > { %763 = vmatmul.f32.vlgmr.msrb.gmra.mxu1 %v726_v2  ;;  %742 = vmatpush.msrb.mxu0 %v2720_v63  ;;  %3761 = vst [vmem:[#allocation18_spill] sm:$0xff] %v3184_v62  ;;  %v3191_v63 = vld [vmem:[%s3695_s3 + $0xb0] sm:$0xff] }
  0xc2   : > { %743 = vmatmul.f32.vlgmr.msrb.gmra.mxu0 %v726_v2  ;;  %3762 = vst [vmem:[#allocation19_spill] sm:$0xff] %v3191_v63  ;;  %v3217_v2 = vld [vmem:[%s3695_s3 + $0xa8] sm:$0xff] }
  0xc3   : > { %3765 = vst [vmem:[#allocation22_spill] sm:$0xff] %v3217_v2 }
  0xf1   : > { %v549_v3 = vpop.f32.mrf.mxu3 }
  0xf2   : > { %852 = vmatpush.msra.mxu0 %v549_v3  ;;  %v3224_v3 = vld [vmem:[%s3695_s3 + $0x118] sm:$0xff] }
  0xf3   : > { %v529_v4 = vpop.f32.mrf.mxu2 }
  0xf4   : > { %853 = vmatpush.msra.mxu0 %v529_v4  ;;  %v3229_v4 = vld [vmem:[%s3695_s3 + $0x20] sm:$0xff] }
  0xf5   : > { %3766 = vst [vmem:[#allocation23_spill] sm:$0xff] %v3229_v4 }
  0xf7   : > { %v509_v5 = vpop.f32.mrf.mxu1 }
  0xf8   : > { %854 = vmatpush.msra.mxu0 %v509_v5  ;;  %v3235_v5 = vld [vmem:[%s3695_s3 + $0x1a8] sm:$0xff] }
  0xf9   : > { %v489_v6 = vpop.f32.mrf.mxu0  ;;  %3767 = vst [vmem:[#allocation24_spill] sm:$0xff] %v3235_v5 }
  0xfa   : > { %855 = vmatpush.msra.mxu0 %v489_v6  ;;  %v3241_v6 = vld [vmem:[%s3695_s3 + $0xa0] sm:$0xff] }
  0xfb   : > { %1846 = vmatmul.msk.f32.vlgmr.msra.gmra.mxu0 %vm827_vm0, %v394_v11  ;;  %3768 = vst [vmem:[#allocation25_spill] sm:$0xff] %v3241_v6 }
  0xfc   : > { %956 = vmatpush.msrb.mxu0 %v2964_v22 }
  0xfe   : > { %957 = vmatpush.msrb.mxu0 %v2981_v26 }
 0x100   : > { %958 = vmatpush.msrb.mxu0 %v2992_v28 }
 0x102   : > { %959 = vmatpush.msrb.mxu0 %v3017_v35 }
 0x103   : > { %1847 = vmatmul.msk.f32.gmra.mxu0 %vm827_vm0, %v2925_v12 }
 0x104   : > { %960 = vmatpush.msrb.mxu0 %v3041_v39 }
 0x106   : > { %961 = vmatpush.msrb.mxu0 %v3065_v43 }
 0x108   : > { %962 = vmatpush.msrb.mxu0 %v3103_v49 }
 0x10a   : > { %963 = vmatpush.msrb.mxu0 %v3129_v53 }
 0x10b   : > { %1848 = vmatmul.msk.f32.gmra.mxu0 %vm827_vm0, %v2934_v13 }
 0x10c   : > { %964 = vmatpush.msrb.mxu0 %v3153_v57 }
 0x10e   : > { %965 = vmatpush.msrb.mxu0 %v3179_v61 }
 0x110   : > { %966 = vmatpush.msrb.mxu0 %v3204_v0 }
 0x112   : > { %967 = vmatpush.msrb.mxu0 %v3229_v4  ;;  %v462_v4 = vld [vmem:[#allocation6] sm:$0xff] }
 0x113   : > { %1849 = vmatmul.msk.f32.gmra.mxu0 %vm827_vm0, %v2943_v18  ;;  %1118 = vst [vmem:[#allocation1] ss:$4 sm:$0xff] %v462_v4 }
 0x115   : > { %v634_v7 = vpop.f32.mrf.mxu3 }
 0x116   : > { %881 = vmatpush.msra.mxu1 %v634_v7  ;;  %v3248_v7 = vld [vmem:[%s3695_s3 + $0x110] sm:$0xff] }
 0x117   : > { %v614_v8 = vpop.f32.mrf.mxu2 }
 0x118   : > { %882 = vmatpush.msra.mxu1 %v614_v8  ;;  %v3253_v8 = vld [vmem:[%s3695_s3 + $0x18] sm:$0xff] }
 0x119   : > { %3769 = vst [vmem:[#allocation26_spill] sm:$0xff] %v3253_v8  ;;  %968 = vmatpush.msrb.mxu0 %v3253_v8 }
 0x11b   : > { %v594_v9 = vpop.f32.mrf.mxu1 }
 0x11c   : > { %883 = vmatpush.msra.mxu1 %v594_v9  ;;  %v3259_v9 = vld [vmem:[%s3695_s3 + $0x1a0] sm:$0xff] }
 0x11d   : > { %v574_v10 = vpop.f32.mrf.mxu0  ;;  %3770 = vst [vmem:[#allocation27_spill] sm:$0xff] %v3259_v9 }
 0x11e   : > { %884 = vmatpush.msra.mxu1 %v574_v10  ;;  %v3265_v10 = vld [vmem:[%s3695_s3 + $0x98] sm:$0xff] }
 0x11f   : > { %1850 = vmatmul.msk.f32.vlgmr.msra.gmra.mxu1 %vm827_vm0, %v394_v11  ;;  %3771 = vst [vmem:[#allocation28_spill] sm:$0xff] %v3265_v10 }
 0x120   : > { %985 = vmatpush.msrb.mxu1 %v2969_v23 }
 0x122   : > { %986 = vmatpush.msrb.mxu1 %v2986_v27 }
 0x124   : > { %987 = vmatpush.msrb.mxu1 %v2999_v30 }
 0x126   : > { %988 = vmatpush.msrb.mxu1 %v3029_v37 }
 0x127   : > { %1851 = vmatmul.msk.f32.gmra.mxu1 %vm827_vm0, %v2925_v12 }
 0x128   : > { %989 = vmatpush.msrb.mxu1 %v3053_v41 }
 0x12a   : > { %990 = vmatpush.msrb.mxu1 %v3077_v45 }
 0x12c   : > { %991 = vmatpush.msrb.mxu1 %v3111_v50 }
 0x12e   : > { %992 = vmatpush.msrb.mxu1 %v3136_v54 }
 0x12f   : > { %1852 = vmatmul.msk.f32.gmra.mxu1 %vm827_vm0, %v2934_v13 }
 0x130   : > { %993 = vmatpush.msrb.mxu1 %v3160_v58 }
 0x131   : > { %v719_v14 = vpop.f32.mrf.mxu3 }
 0x132   : > { %910 = vmatpush.msra.mxu2 %v719_v14  ;;  %994 = vmatpush.msrb.mxu1 %v3191_v63  ;;  %v3296_v14 = vld [vmem:[%s3695_s3 + $0x10] sm:$0xff] }
 0x133   : > { %v699_v15 = vpop.f32.mrf.mxu2  ;;  %3774 = vst [vmem:[#allocation31_spill] sm:$0xff] %v3296_v14  ;;  %969 = vmatpush.msrb.mxu0 %v3296_v14 }
 0x134   : > { %911 = vmatpush.msra.mxu2 %v699_v15  ;;  %995 = vmatpush.msrb.mxu1 %v3217_v2  ;;  %v3301_v15 = vld [vmem:[%s3695_s3 + $0x90] sm:$0xff] }
 0x135   : > { %v679_v16 = vpop.f32.mrf.mxu1  ;;  %3775 = vst [vmem:[#allocation32_spill] sm:$0xff] %v3301_v15 }
 0x136   : > { %912 = vmatpush.msra.mxu2 %v679_v16  ;;  %996 = vmatpush.msrb.mxu1 %v3241_v6  ;;  %v3306_v16 = vld [vmem:[%s3695_s3 + $0x100] sm:$0xff] }
 0x137   : > { %v659_v17 = vpop.f32.mrf.mxu0  ;;  %1853 = vmatmul.msk.f32.gmra.mxu1 %vm827_vm0, %v2943_v18 }
 0x138   : > { %913 = vmatpush.msra.mxu2 %v659_v17  ;;  %997 = vmatpush.msrb.mxu1 %v3265_v10  ;;  %v3313_v17 = vld [vmem:[%s3695_s3 + $0x188] sm:$0xff] }
 0x139   : > { %1854 = vmatmul.msk.f32.vlgmr.msra.gmra.mxu2 %vm827_vm0, %v394_v11  ;;  %3776 = vst [vmem:[#allocation33_spill] sm:$0xff] %v3313_v17 }
 0x13a   : > { %v804_v19 = vpop.f32.mrf.mxu3  ;;  %1014 = vmatpush.msrb.mxu2 %v2953_v20  ;;  %998 = vmatpush.msrb.mxu1 %v3301_v15  ;;  %v3347_v15 = vld [vmem:[%s3695_s3 + $0x80] sm:$0xff] }
 0x13b   : > { %939 = vmatpush.msra.mxu3 %v804_v19  ;;  %v3325_v19 = vld [vmem:[%s3695_s3 + $0x88] sm:$0xff]  ;;  %3783 = vst [vmem:[#allocation40_spill] sm:$0xff] %v3347_v15 }
 0x13c   : > { %v784_v24 = vpop.f32.mrf.mxu2  ;;  %1015 = vmatpush.msrb.mxu2 %v2958_v21  ;;  %3778 = vst [vmem:[#allocation35_spill] sm:$0xff] %v3325_v19  ;;  %999 = vmatpush.msrb.mxu1 %v3325_v19 }
 0x13d   : > { %940 = vmatpush.msra.mxu3 %v784_v24  ;;  %v3330_v24 = vld [vmem:[%s3695_s3 + $0x180] sm:$0xff] }
 0x13e   : > { %v764_v29 = vpop.f32.mrf.mxu1  ;;  %1016 = vmatpush.msrb.mxu2 %v2976_v25  ;;  %3779 = vst [vmem:[#allocation36_spill] sm:$0xff] %v3330_v24  ;;  %1000 = vmatpush.msrb.mxu1 %v3347_v15 }
 0x13f   : > { %941 = vmatpush.msra.mxu3 %v764_v29  ;;  %v744_v32 = vpop.f32.mrf.mxu0 }
 0x140   : > { %1017 = vmatpush.msrb.mxu2 %v3005_v33 }
 0x141   : > { %942 = vmatpush.msra.mxu3 %v744_v32  ;;  %1855 = vmatmul.msk.f32.gmra.mxu2 %vm827_vm0, %v2925_v12 }
 0x142   : > { %1858 = vmatmul.msk.f32.vlgmr.msra.gmra.mxu3 %vm827_vm0, %v394_v11  ;;  %1018 = vmatpush.msrb.mxu2 %v3024_v36  ;;  %v3272_v11 = vld [vmem:[%s3695_s3 + $0x108] sm:$0xff] }
 0x143   : > { %1043 = vmatpush.msrb.mxu3 %v3010_v34 }
 0x144   : > { %1019 = vmatpush.msrb.mxu2 %v3048_v40 }
 0x145   : > { %1044 = vmatpush.msrb.mxu3 %v3035_v38 }
 0x146   : > { %1020 = vmatpush.msrb.mxu2 %v3072_v44 }
 0x147   : > { %1045 = vmatpush.msrb.mxu3 %v3058_v42 }
 0x148   : > { %1021 = vmatpush.msrb.mxu2 %v3091_v47 }
 0x149   : > { %1856 = vmatmul.msk.f32.gmra.mxu2 %vm827_vm0, %v2934_v13  ;;  %1046 = vmatpush.msrb.mxu3 %v3082_v46 }
 0x14a   : > { %1859 = vmatmul.msk.f32.gmra.mxu3 %vm827_vm0, %v2925_v12  ;;  %1022 = vmatpush.msrb.mxu2 %v3116_v51  ;;  %v3278_v12 = vld [vmem:[%s3695_s3 + $0x198] sm:$0xff] }
 0x14b   : > { %1047 = vmatpush.msrb.mxu3 %v3096_v48  ;;  %3772 = vst [vmem:[#allocation29_spill] sm:$0xff] %v3278_v12 }
 0x14c   : > { %1023 = vmatpush.msrb.mxu2 %v3141_v55 }
 0x14d   : > { %1048 = vmatpush.msrb.mxu3 %v3123_v52 }
 0x14e   : > { %1024 = vmatpush.msrb.mxu2 %v3165_v59 }
 0x14f   : > { %1049 = vmatpush.msrb.mxu3 %v3146_v56 }
 0x150   : > { %1025 = vmatpush.msrb.mxu2 %v3199_v31 }
 0x151   : > { %1857 = vmatmul.msk.f32.gmra.mxu2 %vm827_vm0, %v2943_v18  ;;  %1050 = vmatpush.msrb.mxu3 %v3170_v60 }
 0x152   : > { %1860 = vmatmul.msk.f32.gmra.mxu3 %vm827_vm0, %v2934_v13  ;;  %1026 = vmatpush.msrb.mxu2 %v3224_v3  ;;  %v3289_v13 = vld [vmem:[%s3695_s3 + $0x190] sm:$0xff] }
 0x153   : > { %1051 = vmatpush.msrb.mxu3 %v3184_v62  ;;  %3773 = vst [vmem:[#allocation30_spill] sm:$0xff] %v3289_v13 }
 0x154   : > { %1027 = vmatpush.msrb.mxu2 %v3248_v7 }
 0x155   : > { %1052 = vmatpush.msrb.mxu3 %v3211_v1 }
 0x156   : > { %1028 = vmatpush.msrb.mxu2 %v3272_v11 }
 0x157   : > { %1053 = vmatpush.msrb.mxu3 %v3235_v5 }
 0x158   : > { %1029 = vmatpush.msrb.mxu2 %v3306_v16 }
 0x159   : > { %1054 = vmatpush.msrb.mxu3 %v3259_v9 }
 0x15a   : > { %1861 = vmatmul.msk.f32.gmra.mxu3 %vm827_vm0, %v2943_v18  ;;  %v3320_v18 = vld [vmem:[%s3695_s3 + $0x8] sm:$0xff] }
 0x15b   : > { %1055 = vmatpush.msrb.mxu3 %v3278_v12  ;;  %3777 = vst [vmem:[#allocation34_spill] sm:$0xff] %v3320_v18  ;;  %970 = vmatpush.msrb.mxu0 %v3320_v18 }
 0x15d   : > { %1056 = vmatpush.msrb.mxu3 %v3289_v13 }
 0x15f   : > { %1057 = vmatpush.msrb.mxu3 %v3313_v17  ;;  %v3342_v17 = vld [vmem:[%s3695_s3] sm:$0xff] }
 0x160   : > { %3782 = vst [vmem:[#allocation39_spill] sm:$0xff] %v3342_v17  ;;  %971 = vmatpush.msrb.mxu0 %v3342_v17 }
 0x161   : > { %1058 = vmatpush.msrb.mxu3 %v3330_v24 }
 0x178   : > { %v3335_v29 = vpop.f32.mrf.mxu0 }
 0x179   : > { %3780 = vst [vmem:[#allocation37_spill] sm:$0xff] %v3335_v29  ;;  %972 = vmatmul.f32.vlgmr.msrb.gmra.mxu0 %v3335_v29 }
 0x180   : > { %v3353_v24 = vpop.f32.mrf.mxu0 }
 0x181   : > { %3784 = vst [vmem:[#allocation41_spill] sm:$0xff] %v3353_v24  ;;  %975 = vmatmul.f32.gmra.mxu0 %v3353_v24 }
 0x188   : > { %v3359_v18 = vpop.f32.mrf.mxu0 }
 0x189   : > { %3786 = vst [vmem:[#allocation43_spill] sm:$0xff] %v3359_v18  ;;  %978 = vmatmul.f32.gmra.mxu0 %v3359_v18 }
 0x19c   : > { %v3337_v32 = vpop.f32.mrf.mxu1 }
 0x19d   : > { %3781 = vst [vmem:[#allocation38_spill] sm:$0xff] %v3337_v32  ;;  %1001 = vmatmul.f32.vlgmr.msrb.gmra.mxu1 %v3337_v32  ;;  %v3368_v32 = vpop.f32.mrf.mxu0 }
 0x19e   : > { %3789 = vst [vmem:[#allocation46_spill] sm:$0xff] %v3368_v32  ;;  %981 = vmatmul.f32.gmra.mxu0 %v3368_v32 }
 0x1a4   : > { %v3355_v19 = vpop.f32.mrf.mxu1 }
 0x1a5   : > { %3785 = vst [vmem:[#allocation42_spill] sm:$0xff] %v3355_v19  ;;  %1004 = vmatmul.f32.gmra.mxu1 %v3355_v19 }
 0x1ac   : > { %v3361_v13 = vpop.f32.mrf.mxu1 }
 0x1ad   : > { %3787 = vst [vmem:[#allocation44_spill] sm:$0xff] %v3361_v13  ;;  %1007 = vmatmul.f32.gmra.mxu1 %v3361_v13 }
 0x1b4   : > { %v3370_v29 = vpop.f32.mrf.mxu1 }
 0x1b5   : > { %3790 = vst [vmem:[#allocation47_spill] sm:$0xff] %v3370_v29  ;;  %1010 = vmatmul.f32.gmra.mxu1 %v3370_v29 }
 0x1bc   : > { %v3365_v15 = vpop.f32.mrf.mxu2 }
 0x1bd   : > { %3788 = vst [vmem:[#allocation45_spill] sm:$0xff] %v3365_v15  ;;  %1030 = vmatmul.f32.vlgmr.msrb.gmra.mxu2 %v3365_v15 }
 0x1c4   : > { %v3374_v19 = vpop.f32.mrf.mxu2 }
 0x1c5   : > { %3791 = vst [vmem:[#allocation48_spill] sm:$0xff] %v3374_v19  ;;  %v3376_v24 = vpop.f32.mrf.mxu3  ;;  %1033 = vmatmul.f32.gmra.mxu2 %v3374_v19 }
 0x1c6   : > { %3792 = vst [vmem:[#allocation49_spill] sm:$0xff] %v3376_v24  ;;  %1059 = vmatmul.f32.vlgmr.msrb.gmra.mxu3 %v3376_v24 }
 0x1cc   : > { %v3380_v13 = vpop.f32.mrf.mxu2 }
 0x1cd   : > { %3793 = vst [vmem:[#allocation50_spill] sm:$0xff] %v3380_v13  ;;  %v3382_v18 = vpop.f32.mrf.mxu3  ;;  %1036 = vmatmul.f32.gmra.mxu2 %v3380_v13 }
 0x1ce   : > { %3794 = vst [vmem:[#allocation51_spill] sm:$0xff] %v3382_v18  ;;  %1062 = vmatmul.f32.gmra.mxu3 %v3382_v18 }
 0x1d4   : > { %v3386_v15 = vpop.f32.mrf.mxu2 }
 0x1d5   : > { %3795 = vst [vmem:[#allocation52_spill] sm:$0xff] %v3386_v15  ;;  %v3388_v32 = vpop.f32.mrf.mxu3  ;;  %1039 = vmatmul.f32.gmra.mxu2 %v3386_v15 }
 0x1d6   : > { %3796 = vst [vmem:[#allocation53_spill] sm:$0xff] %v3388_v32  ;;  %1065 = vmatmul.f32.gmra.mxu3 %v3388_v32 }
 0x1dd   : > { %v3392_v29 = vpop.f32.mrf.mxu3 }
 0x1de   : > { %3797 = vst [vmem:[#allocation54_spill] sm:$0xff] %v3392_v29  ;;  %1068 = vmatmul.f32.gmra.mxu3 %v3392_v29  ;;  %v1121_v29 = vld.sshfl [vmem:[#allocation1 + $0x10] sm:$0xff pattern:$0x73625140] }
 0x1df   : > { %1876 = vmatpush.msk.msra.mxu3 %vm1136_vm1, %v1121_v29 }
 0x1e1   : > { %1351 = vmatpush.msrb.mxu3 %v2953_v20 }
 0x1e3   : > { %1352 = vmatpush.msrb.mxu3 %v2958_v21 }
 0x1e5   : > { %1353 = vmatpush.msrb.mxu3 %v2976_v25  ;;  %v3404_v25 = vld [vmem:[#allocation8 + $0x10] sm:$0xff] }
 0x1e7   : > { %1354 = vmatpush.msrb.mxu3 %v3005_v33  ;;  %v3413_v33 = vld [vmem:[#allocation8 + $0x8] sm:$0xff] }
 0x1e9   : > { %1355 = vmatpush.msrb.mxu3 %v3024_v36  ;;  %v3415_v36 = vld [vmem:[#allocation8 + $0x18] sm:$0xff] }
 0x1eb   : > { %1356 = vmatpush.msrb.mxu3 %v3048_v40  ;;  %v1119_v40 = vld.sshfl [vmem:[#allocation1] sm:$0xff pattern:$0x73625140] }
 0x1ec   : > { %1866 = vmatpush.msk.msra.mxu1 %vm1136_vm1, %v1119_v40 }
 0x1ed   : > { %1357 = vmatpush.msrb.mxu3 %v3072_v44  ;;  %v1120_v44 = vld.sshfl [vmem:[#allocation1 + $0x8] sm:$0xff pattern:$0x73625140] }
 0x1ee   : > { %1293 = vmatpush.msrb.mxu1 %v2964_v22  ;;  %v3798_v22 = vld [vmem:[#allocation16_spill] sm:$0xff] }
 0x1ef   : > { %1358 = vmatpush.msrb.mxu3 %v3091_v47  ;;  %v1122_v47 = vld.sshfl [vmem:[#allocation1 + $0x18] sm:$0xff pattern:$0x73625140] }
 0x1f0   : > { %1510 = vst [vmem:[#allocation1] ss:$4 sm:$0xff] %v462_v4  ;;  %1294 = vmatpush.msrb.mxu1 %v2981_v26  ;;  %v3800_v26 = vld [vmem:[#allocation14_spill] sm:$0xff]  ;;  %v3824_v4 = vld [vmem:[#allocation37_spill] sm:$0xff] }
 0x1f1   : > { %1359 = vmatpush.msrb.mxu3 %v3116_v51  ;;  %v3817_v51 = vld [vmem:[#allocation32_spill] sm:$0xff] }
 0x1f2   : > { %1295 = vmatpush.msrb.mxu1 %v2992_v28  ;;  %v3802_v28 = vld [vmem:[#allocation15_spill] sm:$0xff] }
 0x1f3   : > { %1360 = vmatpush.msrb.mxu3 %v3141_v55  ;;  %v3820_v55 = vld [vmem:[#allocation35_spill] sm:$0xff] }
 0x1f4   : > { %1296 = vmatpush.msrb.mxu1 %v3017_v35  ;;  %v3805_v35 = vld [vmem:[#allocation19_spill] sm:$0xff] }
 0x1f5   : > { %1361 = vmatpush.msrb.mxu3 %v3165_v59  ;;  %v3823_v59 = vld [vmem:[#allocation40_spill] sm:$0xff] }
 0x1f6   : > { %v973_v19 = vpop.f32.mrf.mxu0  ;;  %1297 = vmatpush.msrb.mxu1 %v3041_v39  ;;  %v3808_v39 = vld [vmem:[#allocation22_spill] sm:$0xff] }
 0x1f7   : > { %1362 = vmatpush.msrb.mxu3 %v3199_v31 }
 0x1f8   : > { %1298 = vmatpush.msrb.mxu1 %v3065_v43  ;;  %v3811_v43 = vld [vmem:[#allocation25_spill] sm:$0xff] }
 0x1f9   : > { %1363 = vmatpush.msrb.mxu3 %v3224_v3 }
 0x1fa   : > { %1299 = vmatpush.msrb.mxu1 %v3103_v49  ;;  %v3815_v49 = vld [vmem:[#allocation31_spill] sm:$0xff] }
 0x1fb   : > { %1364 = vmatpush.msrb.mxu3 %v3248_v7  ;;  %v3825_v7 = vld [vmem:[#allocation49_spill] sm:$0xff] }
 0x1fc   : > { %1300 = vmatpush.msrb.mxu1 %v3129_v53 }
 0x1fd   : > { %1365 = vmatpush.msrb.mxu3 %v3272_v11 }
 0x1fe   : > { %v976_v14 = vpop.f32.mrf.mxu0  ;;  %1301 = vmatpush.msrb.mxu1 %v3800_v26  ;;  %v3831_v26 = vld [vmem:[#allocation48_spill] sm:$0xff] }
 0x1ff   : > { %1366 = vmatpush.msrb.mxu3 %v3306_v16  ;;  %v3827_v16 = vld [vmem:[#allocation45_spill] sm:$0xff] }
 0x206   : > { %v979_v18 = vpop.f32.mrf.mxu0 }
 0x21a   : > { %v1002_v24 = vpop.f32.mrf.mxu1 }
 0x21b   : > { %v982_v15 = vpop.f32.mrf.mxu0  ;;  %v1003_v58 = vadd.f32 %v1002_v24, %v973_v19  ;;  %v3828_v24 = vld [vmem:[#allocation41_spill] sm:$0xff] }
 0x222   : > { %v1005_v10 = vpop.f32.mrf.mxu1 }
 0x223   : > { %v1006_v1 = vadd.f32 %v1005_v10, %v976_v14 }
 0x22a   : > { %v1008_v8 = vpop.f32.mrf.mxu1 }
 0x22b   : > { %v1009_v63 = vadd.f32 %v1008_v8, %v979_v18 }
 0x232   : > { %v1011_v2 = vpop.f32.mrf.mxu1 }
 0x233   : > { %v1012_v5 = vadd.f32 %v1011_v2, %v982_v15 }
 0x240   : > { %v1031_v17 = vpop.f32.mrf.mxu2 }
 0x241   : > { %v1032_v2 = vadd.f32 %v1031_v17, %v1003_v58  ;;  %v3822_v58 = vld [vmem:[#allocation36_spill] sm:$0xff] }
 0x248   : > { %v1034_v13 = vpop.f32.mrf.mxu2 }
 0x249   : > { %v1060_v12 = vpop.f32.mrf.mxu3  ;;  %v1035_v54 = vadd.f32 %v1034_v13, %v1006_v1 }
 0x24a   : > { %v1061_v21 = vadd.f32 %v1060_v12, %v1032_v2  ;;  %v3826_v12 = vld [vmem:[#allocation38_spill] sm:$0xff] }
 0x250   : > { %v1037_v9 = vpop.f32.mrf.mxu2 }
 0x251   : > { %v1063_v6 = vpop.f32.mrf.mxu3  ;;  %v1038_v62 = vadd.f32 %v1037_v9, %v1009_v63  ;;  %v3402_v63 = vld [vmem:[#allocation8] sm:$0xff] }
 0x252   : > { %v1064_v20 = vadd.f32 %v1063_v6, %v1035_v54  ;;  %v3819_v54 = vld [vmem:[#allocation33_spill] sm:$0xff] }
 0x258   : > { %v1040_v0 = vpop.f32.mrf.mxu2 }
 0x259   : > { %v1066_v32 = vpop.f32.mrf.mxu3  ;;  %v1041_v61 = vadd.f32 %v1040_v0, %v1012_v5 }
 0x25a   : > { %v1067_v15 = vadd.f32 %v1066_v32, %v1038_v62 }
 0x261   : > { %v1069_v57 = vpop.f32.mrf.mxu3 }
 0x262   : > { %v1070_v60 = vadd.f32 %v1069_v57, %v1041_v61  ;;  %v3821_v57 = vld [vmem:[#allocation39_spill] sm:$0xff] }
 0x264   : > { %1096 = vmatpush.msra.mxu0 %v1070_v60  ;;  %1923 = vmatpush.msra.mxu2 %v1070_v60 }
 0x266   : > { %1097 = vmatpush.msra.mxu0 %v1067_v15  ;;  %1924 = vmatpush.msra.mxu2 %v1067_v15  ;;  %v3829_v15 = vld [vmem:[#allocation51_spill] sm:$0xff] }
 0x268   : > { %1098 = vmatpush.msra.mxu0 %v1064_v20  ;;  %1925 = vmatpush.msra.mxu2 %v1064_v20 }
 0x26a   : > { %1099 = vmatpush.msra.mxu0 %v1061_v21  ;;  %1926 = vmatpush.msra.mxu2 %v1061_v21 }
 0x26b   : > { %1862 = vmatmul.msk.f32.vlgmr.msra.gmra.mxu0 %vm827_vm0, %v3402_v63  ;;  %1864 = vmatmul.msk.f32.vlgmr.msra.gmra.mxu2 %vm827_vm0, %v3404_v25 }
 0x26c   : > { %1871 = vmatpush.msk.msrb.mxu2 %vm1136_vm1, %v1120_v44  ;;  %1881 = vmatpush.msk.msrb.mxu0 %vm1136_vm1, %v1122_v47  ;;  %v3830_v47 = vld [vmem:[#allocation42_spill] sm:$0xff] }
 0x26e   : > { %1380 = vmatpush.msra.mxu0 %v3010_v34  ;;  %1322 = vmatpush.msra.mxu2 %v2969_v23  ;;  %v3799_v23 = vld [vmem:[#allocation13_spill] sm:$0xff] }
 0x26f   : > { %v3804_v34 = vld [vmem:[#allocation21_spill] sm:$0xff] }
 0x270   : > { %1381 = vmatpush.msra.mxu0 %v3035_v38  ;;  %1323 = vmatpush.msra.mxu2 %v2986_v27  ;;  %v3801_v27 = vld [vmem:[#allocation18_spill] sm:$0xff]  ;;  %v3807_v38 = vld [vmem:[#allocation24_spill] sm:$0xff] }
 0x272   : > { %1382 = vmatpush.msra.mxu0 %v3058_v42  ;;  %1324 = vmatpush.msra.mxu2 %v2999_v30  ;;  %v3803_v30 = vld [vmem:[#allocation17_spill] sm:$0xff]  ;;  %v3810_v42 = vld [vmem:[#allocation27_spill] sm:$0xff] }
 0x273   : > { %1863 = vmatmul.msk.f32.gmra.mxu0 %vm827_vm0, %v3413_v33  ;;  %1865 = vmatmul.msk.f32.gmra.mxu2 %vm827_vm0, %v3415_v36 }
 0x274   : > { %1383 = vmatpush.msra.mxu0 %v3082_v46  ;;  %1325 = vmatpush.msra.mxu2 %v3029_v37  ;;  %v3806_v37 = vld [vmem:[#allocation20_spill] sm:$0xff]  ;;  %v3813_v46 = vld [vmem:[#allocation29_spill] sm:$0xff] }
 0x275   : > { %1302 = vmatpush.msrb.mxu1 %v3803_v30  ;;  %v3832_v30 = vld [vmem:[#allocation43_spill] sm:$0xff] }
 0x276   : > { %1384 = vmatpush.msra.mxu0 %v3096_v48  ;;  %1326 = vmatpush.msra.mxu2 %v3053_v41  ;;  %v3809_v41 = vld [vmem:[#allocation23_spill] sm:$0xff]  ;;  %v3814_v48 = vld [vmem:[#allocation28_spill] sm:$0xff] }
 0x277   : > { %1303 = vmatpush.msrb.mxu1 %v3806_v37 }
 0x278   : > { %1385 = vmatpush.msra.mxu0 %v3123_v52  ;;  %1327 = vmatpush.msra.mxu2 %v3077_v45  ;;  %v3812_v45 = vld [vmem:[#allocation26_spill] sm:$0xff] }
 0x279   : > { %1304 = vmatpush.msrb.mxu1 %v3809_v41  ;;  %v3818_v52 = vld [vmem:[#allocation34_spill] sm:$0xff] }
 0x27a   : > { %1386 = vmatpush.msra.mxu0 %v3146_v56  ;;  %1328 = vmatpush.msra.mxu2 %v3111_v50  ;;  %v3816_v50 = vld [vmem:[#allocation30_spill] sm:$0xff] }
 0x27b   : > { %1305 = vmatpush.msrb.mxu1 %v3812_v45 }
 0x27c   : > { %1387 = vmatpush.msra.mxu0 %v3798_v22  ;;  %1329 = vmatpush.msra.mxu2 %v3799_v23 }
 0x27d   : > { %1306 = vmatpush.msrb.mxu1 %v3815_v49 }
 0x27e   : > { %1388 = vmatpush.msra.mxu0 %v3801_v27  ;;  %1330 = vmatpush.msra.mxu2 %v3802_v28 }
 0x27f   : > { %1307 = vmatpush.msrb.mxu1 %v3818_v52 }
 0x280   : > { %1389 = vmatpush.msra.mxu0 %v3804_v34  ;;  %1331 = vmatpush.msra.mxu2 %v3805_v35 }
 0x281   : > { %1308 = vmatpush.msrb.mxu1 %v3821_v57  ;;  %v3837_v57 = vld [vmem:[#allocation54_spill] sm:$0xff] }
 0x282   : > { %1390 = vmatpush.msra.mxu0 %v3807_v38  ;;  %1332 = vmatpush.msra.mxu2 %v3808_v39  ;;  %v3833_v38 = vld [vmem:[#allocation53_spill] sm:$0xff] }
 0x284   : > { %1391 = vmatpush.msra.mxu0 %v3810_v42  ;;  %1333 = vmatpush.msra.mxu2 %v3811_v43 }
 0x286   : > { %1392 = vmatpush.msra.mxu0 %v3813_v46  ;;  %1334 = vmatpush.msra.mxu2 %v3814_v48  ;;  %v3834_v46 = vld [vmem:[#allocation44_spill] sm:$0xff] }
 0x288   : > { %1393 = vmatpush.msra.mxu0 %v3816_v50  ;;  %1335 = vmatpush.msra.mxu2 %v3817_v51  ;;  %v3835_v50 = vld [vmem:[#allocation50_spill] sm:$0xff] }
 0x28a   : > { %1394 = vmatpush.msra.mxu0 %v3819_v54  ;;  %1336 = vmatpush.msra.mxu2 %v3820_v55 }
 0x28c   : > { %1395 = vmatpush.msra.mxu0 %v3822_v58  ;;  %1337 = vmatpush.msra.mxu2 %v3823_v59 }
 0x2e8   : > { %v1101_v53 = vpop.f32.mrf.mxu0 }
 0x2e9   : > { %v1113_v56 = vmul.f32 0.001953125, %v1101_v53  ;;  %v3836_v53 = vld [vmem:[#allocation46_spill] sm:$0xff] }
 0x2eb   : > { %1867 = vmatmul.msk.f32.vlgmr.msra.gmra.mxu1 %vm1123_vm2, %v1113_v56  ;;  %1872 = vmatmul.msk.f32.vlgmr.msrb.gmra.mxu2 %vm1123_vm2, %v1113_v56 }
 0x2ec   : > { %1877 = vmatmul.msk.f32.vlgmr.msra.gmra.mxu3 %vm1123_vm2, %v1113_v56  ;;  %1882 = vmatmul.msk.f32.vlgmr.msrb.gmra.mxu0 %vm1123_vm2, %v1113_v56 }
 0x2ee   : > { %v1107_v62 = vpop.f32.mrf.mxu2 }
 0x2ef   : > { %v1115_v31 = vmul.f32 0.001953125, %v1107_v62 }
 0x2f0   : > { %v1104_v60 = vpop.f32.mrf.mxu0 }
 0x2f1   : > { %v1114_v61 = vmul.f32 0.001953125, %v1104_v60 }
 0x2f3   : > { %1868 = vmatmul.msk.f32.gmra.mxu1 %vm1123_vm2, %v1114_v61  ;;  %1873 = vmatmul.msk.f32.gmra.mxu2 %vm1123_vm2, %v1114_v61 }
 0x2f4   : > { %1878 = vmatmul.msk.f32.gmra.mxu3 %vm1123_vm2, %v1114_v61  ;;  %1883 = vmatmul.msk.f32.gmra.mxu0 %vm1123_vm2, %v1114_v61 }
 0x2f6   : > { %v1110_v0 = vpop.f32.mrf.mxu2 }
 0x2f7   : > { %v1116_v1 = vmul.f32 0.001953125, %v1110_v0 }
 0x2fb   : > { %1869 = vmatmul.msk.f32.gmra.mxu1 %vm1123_vm2, %v1115_v31  ;;  %1874 = vmatmul.msk.f32.gmra.mxu2 %vm1123_vm2, %v1115_v31 }
 0x2fc   : > { %1879 = vmatmul.msk.f32.gmra.mxu3 %vm1123_vm2, %v1115_v31  ;;  %1884 = vmatmul.msk.f32.gmra.mxu0 %vm1123_vm2, %v1115_v31  ;;  %v3838_v31 = vld [vmem:[#allocation47_spill] sm:$0xff] }
 0x303   : > { %1870 = vmatmul.msk.f32.gmra.mxu1 %vm1123_vm2, %v1116_v1  ;;  %1875 = vmatmul.msk.f32.gmra.mxu2 %vm1123_vm2, %v1116_v1 }
 0x304   : > { %1880 = vmatmul.msk.f32.gmra.mxu3 %vm1123_vm2, %v1116_v1  ;;  %1885 = vmatmul.msk.f32.gmra.mxu0 %vm1123_vm2, %v1116_v1 }
 0x368   : > { %v1162_v3 = vpop.f32.mrf.mxu1 }
 0x369   : > { %v3496_v5 = vsub.f32 %v3824_v4, %v1162_v3  ;;  %v1249_v6 = vpop.f32.mrf.mxu0  ;;  %v3839_v3 = vld [vmem:[#allocation52_spill] sm:$0xff] }
 0x36a   : > { %v3499_v8 = vsub.f32 %v3825_v7, %v1249_v6 }
 0x36b   : > { %v1277_v9 = vmul.f32 %v3496_v5, %v3496_v5 }
 0x36c   : > { %v1280_v10 = vmul.f32 %v3499_v8, %v3499_v8 }
 0x36d   : > { %1309 = vmatmul.f32.vlgmr.msrb.gmra.mxu1 %v1277_v9 }
 0x36e   : > { %1396 = vmatmul.f32.vlgmr.msra.gmra.mxu0 %v1280_v10  ;;  %v1191_v11 = vpop.f32.mrf.mxu2 }
 0x36f   : > { %v3506_v13 = vsub.f32 %v3826_v12, %v1191_v11  ;;  %v1220_v14 = vpop.f32.mrf.mxu3 }
 0x370   : > { %v3509_v17 = vsub.f32 %v3827_v16, %v1220_v14  ;;  %v1165_v18 = vpop.f32.mrf.mxu1 }
 0x371   : > { %v1278_v19 = vmul.f32 %v3506_v13, %v3506_v13  ;;  %v3514_v29 = vsub.f32 %v3828_v24, %v1165_v18  ;;  %v1252_v32 = vpop.f32.mrf.mxu0 }
 0x372   : > { %v1279_v2 = vmul.f32 %v3509_v17, %v3509_v17  ;;  %v3519_v20 = vsub.f32 %v3829_v15, %v1252_v32  ;;  %v3578_v32 = vld [vmem:[%s3698_s6] sm:$0xff]  ;;  %v2183_v15 = vmov 0  }
 0x373   : > { %1338 = vmatmul.f32.vlgmr.msra.gmra.mxu2 %v1278_v19  ;;  %v1281_v21 = vmul.f32 %v3514_v29, %v3514_v29  ;;  %2004 = vset.pattern.permute.xlu0 %v2183_v15 }
 0x374   : > { %1367 = vmatmul.f32.vlgmr.msrb.gmra.mxu3 %v1279_v2  ;;  %v1284_v40 = vmul.f32 %v3519_v20, %v3519_v20  ;;  %v3583_v2 = vld [vmem:[%s3698_s6 + $0x10] sm:$0xff]  ;;  %2005 = vset.pattern.permute.xlu1 %v2183_v15  ;;  %v2184_v15 = vmov 1  }
 0x375   : > { %1312 = vmatmul.f32.gmra.mxu1 %v1281_v21  ;;  %1488 = vperm.xlu0 %2004, %v3578_v32  }
 0x376   : > { %1399 = vmatmul.f32.gmra.mxu0 %v1284_v40  ;;  %v1194_v44 = vpop.f32.mrf.mxu2  ;;  %1498 = vperm.xlu1 %2005, %v3583_v2  }
 0x377   : > { %v3526_v22 = vsub.f32 %v3830_v47, %v1194_v44  ;;  %v1223_v23 = vpop.f32.mrf.mxu3  ;;  %v3590_v47 = vld [vmem:[%s3698_s6 + $0x8] sm:$0xff]  ;;  %2006 = vset.pattern.permute.xlu2 %v2184_v15 }
 0x378   : > { %v3529_v27 = vsub.f32 %v3831_v26, %v1223_v23  ;;  %v1168_v28 = vpop.f32.mrf.mxu1  ;;  %v3595_v23 = vld [vmem:[%s3698_s6 + $0x18] sm:$0xff]  ;;  %1668 = vperm.xlu2 %2006, %v3578_v32  }
 0x379   : > { %v3532_v34 = vsub.f32 %v3832_v30, %v1168_v28  ;;  %v1255_v35 = vpop.f32.mrf.mxu0  ;;  %v1282_v37 = vmul.f32 %v3526_v22, %v3526_v22 }
 0x37a   : > { %v3537_v39 = vsub.f32 %v3833_v38, %v1255_v35  ;;  %v1283_v41 = vmul.f32 %v3529_v27, %v3529_v27 }
 0x37b   : > { %1341 = vmatmul.f32.gmra.mxu2 %v1282_v37  ;;  %v1285_v42 = vmul.f32 %v3532_v34, %v3532_v34 }
 0x37c   : > { %1370 = vmatmul.f32.gmra.mxu3 %v1283_v41  ;;  %v1288_v43 = vmul.f32 %v3537_v39, %v3537_v39 }
 0x37d   : > { %1315 = vmatmul.f32.gmra.mxu1 %v1285_v42  ;;  %1493 = vperm.xlu0 %2004, %v3590_v47  }
 0x37e   : > { %1402 = vmatmul.f32.gmra.mxu0 %v1288_v43  ;;  %v1197_v45 = vpop.f32.mrf.mxu2  ;;  %1503 = vperm.xlu1 %2005, %v3595_v23  }
 0x37f   : > { %v3546_v48 = vsub.f32 %v3834_v46, %v1197_v45  ;;  %v1226_v49 = vpop.f32.mrf.mxu3 }
 0x380   : > { %v3549_v51 = vsub.f32 %v3835_v50, %v1226_v49  ;;  %v1171_v52 = vpop.f32.mrf.mxu1  ;;  %1672 = vperm.xlu2 %2006, %v3590_v47  }
 0x381   : > { %v3552_v54 = vsub.f32 %v3836_v53, %v1171_v52  ;;  %v1258_v55 = vpop.f32.mrf.mxu0  ;;  %v1286_v56 = vmul.f32 %v3546_v48, %v3546_v48 }
 0x382   : > { %v3557_v58 = vsub.f32 %v3837_v57, %v1258_v55  ;;  %v1287_v59 = vmul.f32 %v3549_v51, %v3549_v51  ;;  %v1512_v57 = vld.sshfl [vmem:[#allocation1 + $0x8] sm:$0xff pattern:$0x73625140] }
 0x383   : > { %1344 = vmatmul.f32.gmra.mxu2 %v1286_v56  ;;  %v1289_v60 = vmul.f32 %v3552_v54, %v3552_v54  ;;  %v1511_v56 = vld.sshfl [vmem:[#allocation1] sm:$0xff pattern:$0x73625140] }
 0x384   : > { %1373 = vmatmul.f32.gmra.mxu3 %v1287_v59  ;;  %v1292_v61 = vmul.f32 %v3557_v58, %v3557_v58  ;;  %1890 = vmatpush.msk.msrb.mxu2 %vm1136_vm1, %v1511_v56  ;;  %v1513_v59 = vld.sshfl [vmem:[#allocation1 + $0x10] sm:$0xff pattern:$0x73625140] }
 0x385   : > { %1318 = vmatmul.f32.gmra.mxu1 %v1289_v60  ;;  %v1514_v60 = vld.sshfl [vmem:[#allocation1 + $0x18] sm:$0xff pattern:$0x73625140]  ;;  %1900 = vmatpush.msk.msrb.mxu0 %vm1136_vm1, %v1513_v59 }
 0x386   : > { %1405 = vmatmul.f32.gmra.mxu0 %v1292_v61  ;;  %v1200_v62 = vpop.f32.mrf.mxu2  ;;  %2007 = vset.pattern.permute.xlu0 %v2184_v15 }
 0x387   : > { %v3566_v0 = vsub.f32 %v3838_v31, %v1200_v62  ;;  %v1229_v1 = vpop.f32.mrf.mxu3  ;;  %1676 = vperm.xlu0 %2007, %v3583_v2   ;;  %2008 = vset.pattern.permute.xlu1 %v2184_v15 }
 0x388   : > { %v3569_v4 = vsub.f32 %v3839_v3, %v1229_v1  ;;  %1680 = vperm.xlu1 %2008, %v3595_v23  }
 0x389   : > { %v1290_v6 = vmul.f32 %v3566_v0, %v3566_v0 }
 0x38a   : > { %v1291_v7 = vmul.f32 %v3569_v4, %v3569_v4 }
 0x38b   : > { %1347 = vmatmul.f32.gmra.mxu2 %v1290_v6 }
 0x38c   : > { %1376 = vmatmul.f32.gmra.mxu3 %v1291_v7 }
 0x3ea   : > { %v1310_v9 = vpop.f32.mrf.mxu1 }
 0x3eb   : > { %v1397_v10 = vpop.f32.mrf.mxu0 }
 0x3f2   : > { %v1313_v14 = vpop.f32.mrf.mxu1 }
 0x3f3   : > { %v1400_v16 = vpop.f32.mrf.mxu0 }
 0x3f6   : > { %v1339_v11 = vpop.f32.mrf.mxu2 }
 0x3f7   : > { %v1368_v12 = vpop.f32.mrf.mxu3  ;;  %v1340_v41 = vadd.f32 %v1339_v11, %v1310_v9 }
 0x3f9   : > { %v1369_v50 = vadd.f32 %v1368_v12, %v1340_v41 }
 0x3fa   : > { %v1316_v24 = vpop.f32.mrf.mxu1 }
 0x3fb   : > { %v1403_v44 = vpop.f32.mrf.mxu0  ;;  %v1398_v55 = vadd.f32 %v1397_v10, %v1369_v50 }
 0x3fe   : > { %v1342_v18 = vpop.f32.mrf.mxu2 }
 0x3ff   : > { %v1371_v19 = vpop.f32.mrf.mxu3  ;;  %v1343_v35 = vadd.f32 %v1342_v18, %v1313_v14 }
 0x401   : > { %v1372_v46 = vadd.f32 %v1371_v19, %v1343_v35 }
 0x402   : > { %v1319_v28 = vpop.f32.mrf.mxu1 }
 0x403   : > { %v1406_v45 = vpop.f32.mrf.mxu0  ;;  %v1401_v53 = vadd.f32 %v1400_v16, %v1372_v46 }
 0x406   : > { %v1345_v21 = vpop.f32.mrf.mxu2 }
 0x407   : > { %v1374_v40 = vpop.f32.mrf.mxu3  ;;  %v1346_v26 = vadd.f32 %v1345_v21, %v1316_v24 }
 0x409   : > { %v1375_v42 = vadd.f32 %v1374_v40, %v1346_v26 }
 0x40b   : > { %v1404_v52 = vadd.f32 %v1403_v44, %v1375_v42  ;;  %v1489_v44 = vpop.permute.xlu0 %1488 }
 0x40e   : > { %v1348_v30 = vpop.f32.mrf.mxu2 }
 0x40f   : > { %v1349_v37 = vadd.f32 %v1348_v30, %v1319_v28  ;;  %v1377_v38 = vpop.f32.mrf.mxu3 }
 0x411   : > { %v1378_v43 = vadd.f32 %v1377_v38, %v1349_v37 }
 0x413   : > { %v1407_v49 = vadd.f32 %v1406_v45, %v1378_v43  ;;  %v1494_v45 = vpop.permute.xlu0 %1493 }
 0x415   : > { %1421 = vmatpush.msra.mxu1 %v1407_v49  ;;  %1927 = vmatpush.msra.mxu3 %v1407_v49 }
 0x417   : > { %1422 = vmatpush.msra.mxu1 %v1404_v52  ;;  %1928 = vmatpush.msra.mxu3 %v1404_v52 }
 0x419   : > { %1423 = vmatpush.msra.mxu1 %v1401_v53  ;;  %1929 = vmatpush.msra.mxu3 %v1401_v53  ;;  %v1499_v53 = vpop.permute.xlu1 %1498 }
 0x41b   : > { %1424 = vmatpush.msra.mxu1 %v1398_v55  ;;  %1930 = vmatpush.msra.mxu3 %v1398_v55 }
 0x41c   : > { %1886 = vmatmul.msk.f32.vlgmr.msra.gmra.mxu1 %vm827_vm0, %v3402_v63  ;;  %1888 = vmatmul.msk.f32.vlgmr.msra.gmra.mxu3 %vm827_vm0, %v3404_v25 }
 0x41d   : > { %1895 = vmatpush.msk.msrb.mxu3 %vm1136_vm1, %v1512_v57  ;;  %1905 = vmatpush.msk.msrb.mxu1 %vm1136_vm1, %v1514_v60 }
 0x421   : > { %v1504_v59 = vpop.permute.xlu1 %1503 }
 0x424   : > { %1887 = vmatmul.msk.f32.gmra.mxu1 %vm827_vm0, %v3413_v33  ;;  %1889 = vmatmul.msk.f32.gmra.mxu3 %vm827_vm0, %v3415_v36 }
 0x499   : > { %v1426_v63 = vpop.f32.mrf.mxu1 }
 0x49a   : > { %v1438_v25 = vmul.f32 0.001953125, %v1426_v63 }
 0x49c   : > { %v1442_v61 = vadd.f32 1e-05, %v1438_v25 }
 0x49e   : > { %2009 = vrsqrt.f32 %v1442_v61  ;;  %vm1452_vm4 = vweird.f32 %v1442_v61 }
 0x49f   : > { %v1432_v33 = vpop.f32.mrf.mxu3 }
 0x4a0   : > { %v1440_v62 = vmul.f32 0.001953125, %v1432_v33 }
 0x4a1   : > { %v1429_v31 = vpop.f32.mrf.mxu1 }
 0x4a2   : > { %v1439_v36 = vmul.f32 0.001953125, %v1429_v31  ;;  %v1444_v1 = vadd.f32 1e-05, %v1440_v62 }
 0x4a4   : > { %v2010_v3 = vpop.eup %2009  ;;  %v1443_v6 = vadd.f32 1e-05, %v1439_v36  ;;  %2011 = vrsqrt.f32 %v1444_v1  ;;  %vm1472_vm9 = vweird.f32 %v1444_v1 }
 0x4a5   : > { %v1447_v7 = vmul.f32 %v2010_v3, %v1442_v61  ;;  %vm1453_vm3 = vweird.f32 %v2010_v3 }
 0x4a6   : > { %2013 = vrsqrt.f32 %v1443_v6  ;;  %vm1454_vm5 = vmor %vm1452_vm4, %vm1453_vm3  ;;  %vm1462_vm7 = vweird.f32 %v1443_v6 }
 0x4a7   : > { %v1448_v9 = vmul.f32 %v2010_v3, %v1447_v7  ;;  %v1435_v10 = vpop.f32.mrf.mxu3 }
 0x4a8   : > { %v1441_v11 = vmul.f32 0.001953125, %v1435_v10  ;;  %v1677_v10 = vpop.permute.xlu0 %1676 }
 0x4a9   : > { %v1449_v12 = vmul.f32 0.5, %v1448_v9 }
 0x4aa   : > { %v2012_v14 = vpop.eup %2011  ;;  %v1445_v16 = vadd.f32 1e-05, %v1441_v11 }
 0x4ab   : > { %v1467_v18 = vmul.f32 %v2012_v14, %v1444_v1  ;;  %v1450_v19 = vsub.f32 1.5, %v1449_v12  ;;  %vm1473_vm10 = vweird.f32 %v2012_v14  ;;  %v1669_v1 = vpop.permute.xlu2 %1668 }
 0x4ac   : > { %v2014_v24 = vpop.eup %2013  ;;  %2015 = vrsqrt.f32 %v1445_v16  ;;  %vm1474_vm11 = vmor %vm1472_vm9, %vm1473_vm10  ;;  %vm1482_vm12 = vweird.f32 %v1445_v16 }
 0x4ad   : > { %v1457_v21 = vmul.f32 %v2014_v24, %v1443_v6  ;;  %v1468_v40 = vmul.f32 %v2012_v14, %v1467_v18  ;;  %v1451_v26 = vmul.f32 %v2010_v3, %v1450_v19  ;;  %vm1463_vm6 = vweird.f32 %v2014_v24 }
 0x4ae   : > { %vm1464_vm8 = vmor %vm1462_vm7, %vm1463_vm6 }
 0x4af   : > { %v1458_v28 = vmul.f32 %v2014_v24, %v1457_v21  ;;  %v1455_v30 = vsel %vm1454_vm5, %v2010_v3, %v1451_v26  ;;  %v1469_v38 = vmul.f32 0.5, %v1468_v40 }
 0x4b0   : > { %v1506_v35 = vmul.f32 %v1489_v44, %v1455_v30 }
 0x4b1   : > { %v1459_v37 = vmul.f32 0.5, %v1458_v28  ;;  %v1470_v32 = vsub.f32 1.5, %v1469_v38 }
 0x4b2   : > { %v2016_v41 = vpop.eup %2015  ;;  %1891 = vmatmul.msk.f32.vlgmr.msrb.gmra.mxu2 %vm1123_vm2, %v1506_v35  ;;  %1896 = vmatmul.msk.f32.vlgmr.msrb.gmra.mxu3 %vm1123_vm2, %v1506_v35 }
 0x4b3   : > { %v1477_v42 = vmul.f32 %v2016_v41, %v1445_v16  ;;  %1901 = vmatmul.msk.f32.vlgmr.msrb.gmra.mxu0 %vm1123_vm2, %v1506_v35  ;;  %1906 = vmatmul.msk.f32.vlgmr.msrb.gmra.mxu1 %vm1123_vm2, %v1506_v35  ;;  %v1460_v2 = vsub.f32 1.5, %v1459_v37  ;;  %v1471_v52 = vmul.f32 %v2012_v14, %v1470_v32  ;;  %vm1483_vm13 = vweird.f32 %v2016_v41  ;;  %v1673_v35 = vpop.permute.xlu2 %1672 }
 0x4b4   : > { %vm1484_vm14 = vmor %vm1482_vm12, %vm1483_vm13 }
 0x4b5   : > { %v1478_v23 = vmul.f32 %v2016_v41, %v1477_v42  ;;  %v1461_v43 = vmul.f32 %v2014_v24, %v1460_v2  ;;  %v1475_v55 = vsel %vm1474_vm11, %v2012_v14, %v1471_v52 }
 0x4b6   : > { %v1508_v47 = vmul.f32 %v1499_v53, %v1475_v55 }
 0x4b7   : > { %v1465_v46 = vsel %vm1464_vm8, %v2014_v24, %v1461_v43  ;;  %v1479_v50 = vmul.f32 0.5, %v1478_v23 }
 0x4b8   : > { %v1507_v49 = vmul.f32 %v1494_v45, %v1465_v46 }
 0x4b9   : > { %v1480_v56 = vsub.f32 1.5, %v1479_v50 }
 0x4ba   : > { %1892 = vmatmul.msk.f32.gmra.mxu2 %vm1123_vm2, %v1507_v49  ;;  %1897 = vmatmul.msk.f32.gmra.mxu3 %vm1123_vm2, %v1507_v49 }
 0x4bb   : > { %1902 = vmatmul.msk.f32.gmra.mxu0 %vm1123_vm2, %v1507_v49  ;;  %1907 = vmatmul.msk.f32.gmra.mxu1 %vm1123_vm2, %v1507_v49  ;;  %v1481_v57 = vmul.f32 %v2016_v41, %v1480_v56 }
 0x4bd   : > { %v1485_v60 = vsel %vm1484_vm14, %v2016_v41, %v1481_v57  ;;  %v1681_v41 = vpop.permute.xlu1 %1680 }
 0x4be   : > { %v1509_v63 = vmul.f32 %v1504_v59, %v1485_v60 }
 0x4c2   : > { %1893 = vmatmul.msk.f32.gmra.mxu2 %vm1123_vm2, %v1508_v47  ;;  %1898 = vmatmul.msk.f32.gmra.mxu3 %vm1123_vm2, %v1508_v47 }
 0x4c3   : > { %1903 = vmatmul.msk.f32.gmra.mxu0 %vm1123_vm2, %v1508_v47  ;;  %1908 = vmatmul.msk.f32.gmra.mxu1 %vm1123_vm2, %v1508_v47 }
 0x4ca   : > { %1894 = vmatmul.msk.f32.gmra.mxu2 %vm1123_vm2, %v1509_v63  ;;  %1899 = vmatmul.msk.f32.gmra.mxu3 %vm1123_vm2, %v1509_v63 }
 0x4cb   : > { %1904 = vmatmul.msk.f32.gmra.mxu0 %vm1123_vm2, %v1509_v63  ;;  %1909 = vmatmul.msk.f32.gmra.mxu1 %vm1123_vm2, %v1509_v63 }
 0x530   : > { %v1610_v25 = vpop.f32.mrf.mxu0  ;;  %v1639_v61 = vpop.f32.mrf.mxu1 }
 0x531   : > { %v1653_v7 = vmul.f32 %v1610_v25, %v3509_v17  ;;  %v1654_v9 = vmul.f32 %v1639_v61, %v3499_v8 }
 0x533   : > { %v1685_v18 = vadd.f32 %v1669_v1, %v1653_v7  ;;  %v1686_v19 = vadd.f32 %v1669_v1, %v1654_v9 }
 0x535   : > { %v1552_v33 = vpop.f32.mrf.mxu2  ;;  %v1581_v62 = vpop.f32.mrf.mxu3 }
 0x536   : > { %v1651_v21 = vmul.f32 %v1552_v33, %v3496_v5  ;;  %v1652_v40 = vmul.f32 %v1581_v62, %v3506_v13 }
 0x538   : > { %v1613_v31 = vpop.f32.mrf.mxu0  ;;  %v1642_v36 = vpop.f32.mrf.mxu1  ;;  %v1683_v42 = vadd.f32 %v1669_v1, %v1651_v21  ;;  %v1684_v5 = vadd.f32 %v1669_v1, %v1652_v40 }
 0x53d   : > { %v1555_v3 = vpop.f32.mrf.mxu2  ;;  %v1584_v6 = vpop.f32.mrf.mxu3 }
 0x53e   : > { %v1655_v50 = vmul.f32 %v1555_v3, %v3514_v29  ;;  %v1656_v52 = vmul.f32 %v1584_v6, %v3526_v22 }
 0x540   : > { %v1616_v11 = vpop.f32.mrf.mxu0  ;;  %v1645_v12 = vpop.f32.mrf.mxu1  ;;  %v1687_v60 = vadd.f32 %v1673_v35, %v1655_v50  ;;  %v1688_v63 = vadd.f32 %v1673_v35, %v1656_v52 }
 0x541   : > { %v1661_v14 = vmul.f32 %v1616_v11, %v3549_v51  ;;  %v1662_v16 = vmul.f32 %v1645_v12, %v3537_v39  ;;  %v1657_v51 = vmul.f32 %v1613_v31, %v3529_v27  ;;  %v1658_v39 = vmul.f32 %v1642_v36, %v3519_v20 }
 0x543   : > { %v1693_v24 = vadd.f32 %v1677_v10, %v1661_v14  ;;  %v1694_v15 = vadd.f32 %v1677_v10, %v1662_v16  ;;  %v1689_v32 = vadd.f32 %v1673_v35, %v1657_v51  ;;  %v1690_v45 = vadd.f32 %v1673_v35, %v1658_v39 }
 0x545   : > { %v1701_v44 = vadd.f32 %v1693_v24, %v1685_v18  ;;  %v1702_v17 = vadd.f32 %v1694_v15, %v1686_v19  ;;  %v1558_v26 = vpop.f32.mrf.mxu2  ;;  %v1587_v8 = vpop.f32.mrf.mxu3 }
 0x546   : > { %v1659_v28 = vmul.f32 %v1558_v26, %v3532_v34  ;;  %v1660_v30 = vmul.f32 %v1587_v8, %v3546_v48 }
 0x547   : > { %v1709_v37 = vmax.f32 %v1701_v44, 0.0  ;;  %v1710_v38 = vmax.f32 %v1702_v17, 0.0 }
 0x548   : > { %v1691_v13 = vadd.f32 %v1677_v10, %v1659_v28  ;;  %v1692_v2 = vadd.f32 %v1677_v10, %v1660_v30  ;;  %v1619_v23 = vpop.f32.mrf.mxu0  ;;  %v1648_v43 = vpop.f32.mrf.mxu1 }
 0x549   : > { %1910 = vst [vmem:[%s3642_s19 + $0x20] sm:$0xff] %v1709_v37  ;;  %v1665_v27 = vmul.f32 %v1619_v23, %v3569_v4  ;;  %v1666_v20 = vmul.f32 %v1648_v43, %v3557_v58 }
 0x54a   : > { %1911 = vst [vmem:[%s3642_s19 + $0x28] sm:$0xff] %v1710_v38  ;;  %v1699_v34 = vadd.f32 %v1691_v13, %v1683_v42  ;;  %v1700_v48 = vadd.f32 %v1692_v2, %v1684_v5 }
 0x54b   : > { %v1697_v46 = vadd.f32 %v1681_v41, %v1665_v27  ;;  %v1698_v49 = vadd.f32 %v1681_v41, %v1666_v20 }
 0x54c   : > { %v1707_v53 = vmax.f32 %v1699_v34, 0.0  ;;  %v1708_v55 = vmax.f32 %v1700_v48, 0.0 }
 0x54d   : > { %v1705_v4 = vadd.f32 %v1697_v46, %v1689_v32  ;;  %v1706_v58 = vadd.f32 %v1698_v49, %v1690_v45  ;;  %v1561_v56 = vpop.f32.mrf.mxu2  ;;  %v1590_v47 = vpop.f32.mrf.mxu3 }
 0x54e   : > { %1715 = vst [vmem:[%s3642_s19] sm:$0xff] %v1707_v53  ;;  %v1663_v57 = vmul.f32 %v1561_v56, %v3552_v54  ;;  %v1664_v59 = vmul.f32 %v1590_v47, %v3566_v0 }
 0x54f   : > { %1716 = vst [vmem:[%s3642_s19 + $0x8] sm:$0xff] %v1708_v55  ;;  %v1713_v29 = vmax.f32 %v1705_v4, 0.0  ;;  %v1714_v22 = vmax.f32 %v1706_v58, 0.0 }
 0x550   : > { %v1695_v25 = vadd.f32 %v1681_v41, %v1663_v57  ;;  %v1696_v61 = vadd.f32 %v1681_v41, %v1664_v59 }
 0x551   : > { %1912 = vst [vmem:[%s3642_s19 + $0x30] sm:$0xff] %v1713_v29 }
 0x552   : > { %1913 = vst [vmem:[%s3642_s19 + $0x38] sm:$0xff] %v1714_v22  ;;  %v1703_v54 = vadd.f32 %v1695_v25, %v1687_v60  ;;  %v1704_v0 = vadd.f32 %v1696_v61, %v1688_v63 }
 0x554   : > { %v1711_v33 = vmax.f32 %v1703_v54, 0.0  ;;  %v1712_v62 = vmax.f32 %v1704_v0, 0.0 }
 0x556   : > { %1717 = vst [vmem:[%s3642_s19 + $0x10] sm:$0xff] %v1711_v33 }
 0x557   : > { %1718 = vst [vmem:[%s3642_s19 + $0x18] sm:$0xff] %v1712_v62 }
 0x558   : > { %2134 = shalt.err (!%p2131_p11)
}
 0x559   : > { %s2185_s11 = smov 256   ;;  %s2186_s19 = smov 16  }
 0x55a   : > { %1941 = dma.vmem_to_hbm [thread:$0]  (%p2296_p5), %s1739_s30, 1024, %s1741_s29, %s1725_s15, %s2185_s11, %s2185_s11, %s2186_s19  }
 0x55b PF: > { %s1755_s20 = sand.u32 1, %s2165_s24   ;;  %p3840_p12 = scmp.ge.s32.totalorder %s2177_s27, 2 }
 0x55c   : > { %s1756_s21 = scalar_lea.sflag [#allocation5], %s1755_s20 }
 0x55d   : > { %p1955_p13 = pnand %p3840_p12, %p2262_p6 }
 0x55f   : > { %p1956_p0 = pneg %p1955_p13 }
 0x561   : > { %2160 = dma.done.wait (%p1956_p0), %s1756_s21, 1024  }
 0x562   : > { %2162 = vsyncadd (%p1956_p0), %s1756_s21, 4294966272  ;;  %p21_p3 = scmp.ge.s32.totalorder %s2283_s22, 4   ;;  %s3841_s24 = smov %s2169_s25 }
 0x563   : > { %s3842_s25 = smov %s2173_s26  ;;  %s3843_s26 = smov %s2292_s9 }
 0x564   : > { %s3844_s27 = smov %s2283_s22  ;;  %23 = sbr.rel (!%p21_p3) target bundleno = 8 (0x8), region = 102 }
 0x569   :  { %1762 = vsyncpa [#allocation4], 1 }
 0x56a   :  { %1764 = vsyncpa [#allocation4 + $0x1], 1 }
 0x56b   :  { %1765 = vsyncpa [#allocation7], 1 }
 0x56c   :  { %1766 = vsyncpa [#allocation5], 1 }
 0x56d   :  { %1768 = vsyncpa [#allocation5 + $0x1], 1 }

</bundles_post_ra>
